<compile_context>
chip_gen: v7x
topology: tpu7x:2x2x1
jax: 0.10.0
libtpu: 0.0.40
codegen_flags: <defaults>
</compile_context>

<pallas_src>
import functools

import jax
import jax.numpy as jnp
import numpy as np
from jax.experimental import pallas as pl
from jax.experimental.pallas import tpu as pltpu

LN_EPS = 1e-5  # nn.LayerNorm default


def _round_up(v, m):
    return (v + m - 1) // m * m


def _vmem_limit_bytes(weight_bytes, tile_bytes):
    # weights (double-buffered by BlockSpec) + activation tiles + margin.
    # TODO(synk): on v7x (64 MiB VMEM) switch to a hidden-axis K-tiled fc2 when the bf16
    # weights alone exceed ~24 MiB instead of just raising this limit.
    need = int(2 * weight_bytes + 4 * tile_bytes) + (16 << 20)
    return max(32 << 20, min(need, 96 << 20))


# --------------------------------------------------------------------------- kernels ---

def _window_attn_kernel(x_ref, tv_ref, g_ref, b_ref, wqkv_ref, bqkv_ref,
                        wproj_ref, bproj_ref, bias_ref, mask_ref, o_ref, *,
                        num_heads, head_dim, dim, scale, c_real, eps):
    wb, n, cp = x_ref.shape
    cd = wqkv_ref.dtype                          # matmul compute dtype (bf16 by default)

    # ---- fused LayerNorm1 (channels zero-padded to 128 lanes) ----
    x = x_ref[...].astype(jnp.float32)
    lane = jax.lax.broadcasted_iota(jnp.int32, x.shape, dimension=2)
    valid = lane < c_real
    inv_c = 1.0 / c_real
    mean = jnp.sum(x, axis=-1, keepdims=True) * inv_c
    xc = jnp.where(valid, x - mean, 0.0)
    var = jnp.sum(xc * xc, axis=-1, keepdims=True) * inv_c
    xln = xc * jax.lax.rsqrt(var + eps) * g_ref[...] + b_ref[...]
    # zero spatially-padded tokens: reference pads the *normalised* features with zeros
    xln = xln * tv_ref[...]
    x2 = xln.reshape(wb * n, cp)

    # ---- qkv projection ----
    qkv = jnp.dot(x2.astype(cd), wqkv_ref[...],
                  preferred_element_type=jnp.float32) + bqkv_ref[...]
    mask = mask_ref[...]                         # (wb, n, n) additive 0 / -100 mask

    acc = jnp.zeros((wb * n, cp), jnp.float32)
    for h in range(num_heads):                   # static unroll over heads
        q = qkv[:, h * head_dim:(h + 1) * head_dim] * scale
        k = qkv[:, dim + h * head_dim:dim + (h + 1) * head_dim]
        v = qkv[:, 2 * dim + h * head_dim:2 * dim + (h + 1) * head_dim]
        qh = q.reshape(wb, n, head_dim)
        kh = k.reshape(wb, n, head_dim)
        vh = v.reshape(wb, n, head_dim)
        a = jnp.einsum('wnd,wmd->wnm', qh.astype(cd), kh.astype(cd),
                       preferred_element_type=jnp.float32)
        a = a + bias_ref[h] + mask               # rel-pos bias + shifted-window mask
        a = a - jnp.max(a, axis=-1, keepdims=True)
        e = jnp.exp(a)
        p = e * pl.reciprocal(jnp.sum(e, axis=-1, keepdims=True), approx=True)
        oh = jnp.einsum('wnm,wmd->wnd', p.astype(cd), vh.astype(cd),
                        preferred_element_type=jnp.float32)
        # proj(concat_h oh) == sum_h oh @ Wproj[h*hd:(h+1)*hd, :]
        acc = acc + jnp.dot(oh.reshape(wb * n, head_dim).astype(cd),
                            wproj_ref[h * head_dim:(h + 1) * head_dim, :],
                            preferred_element_type=jnp.float32)
    out = acc + bproj_ref[...]
    o_ref[...] = out.reshape(wb, n, cp).astype(o_ref.dtype)


def _mlp_residual_kernel(sc_ref, attn_ref, g_ref, b_ref, w1_ref, b1_ref,
                         w2_ref, b2_ref, o_ref, *, c_real, eps):
    # x = shortcut + attn ; y = x + fc2(gelu(fc1(LN2(x))))
    x = sc_ref[...].astype(jnp.float32) + attn_ref[...].astype(jnp.float32)
    lane = jax.lax.broadcasted_iota(jnp.int32, x.shape, dimension=1)
    valid = lane < c_real
    inv_c = 1.0 / c_real
    mean = jnp.sum(x, axis=-1, keepdims=True) * inv_c
    xc = jnp.where(valid, x - mean, 0.0)
    var = jnp.sum(xc * xc, axis=-1, keepdims=True) * inv_c
    xln = xc * jax.lax.rsqrt(var + eps) * g_ref[...] + b_ref[...]
    cd = w1_ref.dtype
    h = jnp.dot(xln.astype(cd), w1_ref[...], preferred_element_type=jnp.float32)
    h = h + b1_ref[...]
    h = jax.nn.gelu(h, approximate=False)        # exact erf GELU (nn.GELU() default)
    out = jnp.dot(h.astype(cd), w2_ref[...], preferred_element_type=jnp.float32)
    out = out + b2_ref[...]
    o_ref[...] = (x + out).astype(o_ref.dtype)


# -------------------------------------------------------------------------- wrappers ---

def _pick_windows_per_block(nwin, n, requested=None):
    """Largest divisor of windows-per-image giving <= ~512 token rows per grid step."""
    if requested is not None:
        wb = max(1, min(int(requested), nwin))
        while nwin % wb:
            wb -= 1
        return wb
    best = 1
    for d in range(1, nwin + 1):
        if nwin % d == 0 and d * n <= 512:
            best = d
    return best


def window_attention_pallas(xw, tvw, g1, b1, w_qkv, b_qkv, w_proj, b_proj,
                            rel_bias, mask_arr, *, num_heads, dim, scale, c_real,
                            nwin, windows_per_block=None):
    tw, n, cp = xw.shape                         # tw = B * nwin, wb divides nwin (and tw)
    wb = _pick_windows_per_block(nwin, n, windows_per_block)
    nb = nwin // wb                              # mask pattern repeats every image
    head_dim = dim // num_heads
    kernel = functools.partial(_window_attn_kernel, num_heads=num_heads,
                               head_dim=head_dim, dim=dim, scale=scale,
                               c_real=c_real, eps=LN_EPS)
    weight_bytes = (w_qkv.size * w_qkv.dtype.itemsize
                    + w_proj.size * w_proj.dtype.itemsize
                    + rel_bias.size * 4 + mask_arr.size * 4)
    tile_bytes = wb * n * (2 * cp + n + 3 * dim) * 4
    out = pl.pallas_call(
        kernel,
        out_shape=jax.ShapeDtypeStruct((tw, n, cp), xw.dtype),
        grid_spec=pltpu.PrefetchScalarGridSpec(
            num_scalar_prefetch=0,
            grid=(tw // wb,),
            in_specs=[
                pl.BlockSpec((wb, n, cp), lambda i: (i, 0, 0)),        # window tokens
                pl.BlockSpec((wb, n, 1), lambda i: (i, 0, 0)),         # token-valid mask
                pl.BlockSpec((1, cp), lambda i: (0, 0)),               # LN1 gamma
                pl.BlockSpec((1, cp), lambda i: (0, 0)),               # LN1 beta
                pl.BlockSpec((cp, 3 * dim), lambda i: (0, 0)),         # W_qkv (resident)
                pl.BlockSpec((1, 3 * dim), lambda i: (0, 0)),          # b_qkv
                pl.BlockSpec((dim, cp), lambda i: (0, 0)),             # W_proj (resident)
                pl.BlockSpec((1, cp), lambda i: (0, 0)),               # b_proj
                pl.BlockSpec((num_heads, n, n), lambda i: (0, 0, 0)),  # rel-pos bias
                pl.BlockSpec((wb, n, n), lambda i, nb=nb: (i % nb, 0, 0)),  # shift mask
            ],
            out_specs=pl.BlockSpec((wb, n, cp), lambda i: (i, 0, 0)),
        ),
        compiler_params=pltpu.CompilerParams(
            dimension_semantics=("parallel",),
            vmem_limit_bytes=_vmem_limit_bytes(weight_bytes, tile_bytes)),
    )(xw, tvw, g1, b1, w_qkv, b_qkv, w_proj, b_proj, rel_bias, mask_arr)
    return out


def mlp_residual_pallas(shortcut, attn, g2, b2, w1, b1, w2, b2m, *,
                        c_real, eps=LN_EPS, tm=256):
    m, cp = shortcut.shape
    hdp = w1.shape[1]
    tm_eff = min(tm, _round_up(m, 8))
    mp = _round_up(m, tm_eff)
    sc = jnp.pad(shortcut, ((0, mp - m), (0, 0)))
    at = jnp.pad(attn, ((0, mp - m), (0, 0)))
    weight_bytes = w1.size * w1.dtype.itemsize + w2.size * w2.dtype.itemsize
    tile_bytes = tm_eff * (2 * cp + hdp) * 4
    kernel = functools.partial(_mlp_residual_kernel, c_real=c_real, eps=eps)
    out = pl.pallas_call(
        kernel,
        out_shape=jax.ShapeDtypeStruct((mp, cp), shortcut.dtype),
        grid_spec=pltpu.PrefetchScalarGridSpec(
            num_scalar_prefetch=0,
            grid=(mp // tm_eff,),
            in_specs=[
                pl.BlockSpec((tm_eff, cp), lambda i: (i, 0)),   # shortcut rows
                pl.BlockSpec((tm_eff, cp), lambda i: (i, 0)),   # attention-branch rows
                pl.BlockSpec((1, cp), lambda i: (0, 0)),        # LN2 gamma
                pl.BlockSpec((1, cp), lambda i: (0, 0)),        # LN2 beta
                pl.BlockSpec((cp, hdp), lambda i: (0, 0)),      # W1 (resident, bf16)
                pl.BlockSpec((1, hdp), lambda i: (0, 0)),       # b1
                pl.BlockSpec((hdp, cp), lambda i: (0, 0)),      # W2 (resident, bf16)
                pl.BlockSpec((1, cp), lambda i: (0, 0)),        # b2
            ],
            out_specs=pl.BlockSpec((tm_eff, cp), lambda i: (i, 0)),
        ),
        compiler_params=pltpu.CompilerParams(
            dimension_semantics=("parallel",),
            vmem_limit_bytes=_vmem_limit_bytes(weight_bytes, tile_bytes)),
    )(sc, at, g2, b2, w1, b1, w2, b2m)
    return out[:m]


def swin_block_pallas(x, params, *, H, W, window_size, shift_size, num_heads,
                      attn_mask=None, compute_dtype=jnp.bfloat16, tm=256,
                      windows_per_block=None):
    B, L, C = x.shape
    assert L == H * W, "input feature has wrong size"
    ws = window_size
    heads = num_heads
    hd = C // heads
    scale = hd ** -0.5
    hidden = params["w1"].shape[1]
    cp = _round_up(C, 128)                       # lane-dense channel dim
    hdp = _round_up(hidden, 128)                 # lane-dense hidden dim
    m = B * L

    # lane-pad the token slab once; padded channels stay exactly zero end-to-end
    x_p = jnp.pad(x.reshape(m, C), ((0, 0), (0, cp - C)))

    # ---- spatial pad / cyclic shift / window partition (layout only, stays in JAX) ----
    # norm1 is fused into the attention kernel; the token-valid mask re-zeroes the
    # spatially padded tokens in-kernel so they match the reference's zero padding
    # of the *normalised* features.
    # TODO(synk): window partition/reverse and the cyclic roll are pure reshapes /
    # transposes; kept in the wrapper rather than re-implemented as in-kernel DMA gathers.
    x4 = x_p.reshape(B, H, W, cp)
    pad_r = (ws - W % ws) % ws
    pad_b = (ws - H % ws) % ws
    x4 = jnp.pad(x4, ((0, 0), (0, pad_b), (0, pad_r), (0, 0)))
    tv = jnp.pad(jnp.ones((B, H, W, 1), jnp.float32),
                 ((0, 0), (0, pad_b), (0, pad_r), (0, 0)))
    hp, wp = H + pad_b, W + pad_r
    if shift_size > 0:
        x4 = jnp.roll(x4, shift=(-shift_size, -shift_size), axis=(1, 2))
        tv = jnp.roll(tv, shift=(-shift_size, -shift_size), axis=(1, 2))
        mask = attn_mask
    else:
        mask = None
    nwin = (hp // ws) * (wp // ws)
    n = ws * ws

    def _partition(t):
        c = t.shape[-1]
        t = t.reshape(B, hp // ws, ws, wp // ws, ws, c)
        return t.transpose(0, 1, 3, 2, 4, 5).reshape(B * nwin, n, c)

    xw = _partition(x4)
    tvw = _partition(tv)
    if mask is None:
        mask_arr = jnp.zeros((nwin, n, n), jnp.float32)
    else:
        mask_arr = mask.astype(jnp.float32)      # (nwin, n, n); NOT tiled by batch

    # ---- LN1 + window attention (Pallas, fused) ----
    # TODO(synk): the relative_position_bias_table gather is precomputed outside the kernel.
    g1 = jnp.pad(params["ln1_g"], (0, cp - C)).reshape(1, cp).astype(jnp.float32)
    b1 = jnp.pad(params["ln1_b"], (0, cp - C)).reshape(1, cp).astype(jnp.float32)
    w_qkv = jnp.pad(params["w_qkv"], ((0, cp - C), (0, 0))).astype(compute_dtype)
    b_qkv = params["b_qkv"].reshape(1, 3 * C).astype(jnp.float32)
    w_proj = jnp.pad(params["w_proj"], ((0, 0), (0, cp - C))).astype(compute_dtype)
    b_proj = jnp.pad(params["b_proj"], (0, cp - C)).reshape(1, cp).astype(jnp.float32)
    rel_bias = params["rel_bias"].astype(jnp.float32)
    attn_w = window_attention_pallas(
        xw, tvw, g1, b1, w_qkv, b_qkv, w_proj, b_proj, rel_bias, mask_arr,
        num_heads=heads, dim=C, scale=scale, c_real=C, nwin=nwin,
        windows_per_block=windows_per_block)

    # ---- window reverse / un-shift / crop (layout only) ----
    xr = attn_w.reshape(B, hp // ws, wp // ws, ws, ws, cp)
    xr = xr.transpose(0, 1, 3, 2, 4, 5).reshape(B, hp, wp, cp)
    if shift_size > 0:
        xr = jnp.roll(xr, shift=(shift_size, shift_size), axis=(1, 2))
    xr = xr[:, :H, :W, :].reshape(m, cp)

    # ---- residual + norm2 + MLP + residual (Pallas, fused) ----
    g2 = jnp.pad(params["ln2_g"], (0, cp - C)).reshape(1, cp).astype(jnp.float32)
    b2 = jnp.pad(params["ln2_b"], (0, cp - C)).reshape(1, cp).astype(jnp.float32)
    w1 = jnp.pad(params["w1"], ((0, cp - C), (0, hdp - hidden))).astype(compute_dtype)
    b1m = jnp.pad(params["b1"], (0, hdp - hidden)).reshape(1, hdp).astype(jnp.float32)
    w2 = jnp.pad(params["w2"], ((0, hdp - hidden), (0, cp - C))).astype(compute_dtype)
    b2m = jnp.pad(params["b2"], (0, cp - C)).reshape(1, cp).astype(jnp.float32)
    y_p = mlp_residual_pallas(x_p, xr, g2, b2, w1, b1m, w2, b2m, c_real=C, tm=tm)

    return y_p[:, :C].reshape(B, L, C)


# -------------------------------------------------------------- pure-JAX reference ---

def swin_block_reference(x, params, *, H, W, window_size, shift_size, num_heads, attn_mask):
    B, L, C = x.shape
    ws = window_size
    heads = num_heads
    hd = C // heads
    scale = hd ** -0.5

    def ln(v, g, b):
        mu = jnp.mean(v, axis=-1, keepdims=True)
        var = jnp.mean((v - mu) ** 2, axis=-1, keepdims=True)
        return (v - mu) / jnp.sqrt(var + LN_EPS) * g + b

    shortcut = x
    xn = ln(x, params["ln1_g"], params["ln1_b"]).reshape(B, H, W, C)
    pad_r = (ws - W % ws) % ws
    pad_b = (ws - H % ws) % ws
    xn = jnp.pad(xn, ((0, 0), (0, pad_b), (0, pad_r), (0, 0)))
    hp, wp = H + pad_b, W + pad_r
    if shift_size > 0:
        xn = jnp.roll(xn, shift=(-shift_size, -shift_size), axis=(1, 2))
        mask = attn_mask
    else:
        mask = None
    xw = xn.reshape(B, hp // ws, ws, wp // ws, ws, C)
    xw = xw.transpose(0, 1, 3, 2, 4, 5).reshape(-1, ws * ws, C)
    B_, N, _ = xw.shape

    qkv = xw @ params["w_qkv"] + params["b_qkv"]
    qkv = qkv.reshape(B_, N, 3, heads, hd).transpose(2, 0, 3, 1, 4)
    q, k, v = qkv[0] * scale, qkv[1], qkv[2]
    attn = q @ jnp.swapaxes(k, -1, -2) + params["rel_bias"][None]
    if mask is not None:
        nw = mask.shape[0]
        attn = attn.reshape(B_ // nw, nw, heads, N, N) + mask[None, :, None]
        attn = attn.reshape(B_, heads, N, N)
    attn = jax.nn.softmax(attn, axis=-1)
    out = (attn @ v).transpose(0, 2, 1, 3).reshape(B_, N, C)
    out = out @ params["w_proj"] + params["b_proj"]

    xr = out.reshape(B, hp // ws, wp // ws, ws, ws, C)
    xr = xr.transpose(0, 1, 3, 2, 4, 5).reshape(B, hp, wp, C)
    if shift_size > 0:
        xr = jnp.roll(xr, shift=(shift_size, shift_size), axis=(1, 2))
    xr = xr[:, :H, :W, :].reshape(B, L, C)

    x2 = shortcut + xr
    xn2 = ln(x2, params["ln2_g"], params["ln2_b"])
    h1 = jax.nn.gelu(xn2 @ params["w1"] + params["b1"], approximate=False)
    return x2 + h1 @ params["w2"] + params["b2"]


# ------------------------------------------------------------------------ test setup ---

def _relative_position_index(ws):
    coords = np.stack(np.meshgrid(np.arange(ws), np.arange(ws), indexing="ij"))
    cf = coords.reshape(2, -1)
    rel = (cf[:, :, None] - cf[:, None, :]).transpose(1, 2, 0).astype(np.int64)
    rel[:, :, 0] += ws - 1
    rel[:, :, 1] += ws - 1
    rel[:, :, 0] *= 2 * ws - 1
    return rel.sum(-1)                                    # (ws*ws, ws*ws)


def _create_shift_mask(hp, wp, ws, shift):
    img = np.zeros((1, hp, wp, 1), np.float32)
    cnt = 0
    for hs in (slice(0, -ws), slice(-ws, -shift), slice(-shift, None)):
        for wsl in (slice(0, -ws), slice(-ws, -shift), slice(-shift, None)):
            img[:, hs, wsl, :] = cnt
            cnt += 1
    mw = img.reshape(1, hp // ws, ws, wp // ws, ws, 1)
    mw = mw.transpose(0, 1, 3, 2, 4, 5).reshape(-1, ws * ws)
    am = mw[:, None, :] - mw[:, :, None]
    return np.where(am != 0, -100.0, 0.0).astype(np.float32)   # (nW, N, N)


if __name__ == "__main__":
    key = jax.random.PRNGKey(0)
    B, H, W = 2, 8, 8
    C, num_heads = 32, 4
    window_size, shift_size = 4, 2
    mlp_ratio = 4.0
    hidden = int(C * mlp_ratio)
    L = H * W
    N = window_size * window_size

    ks = jax.random.split(key, 14)
    x = jax.random.normal(ks[0], (B, L, C), jnp.float32)

    rpi = _relative_position_index(window_size)
    table = jax.random.normal(ks[1], ((2 * window_size - 1) ** 2, num_heads),
                              jnp.float32) * 0.02
    rel_bias = table[rpi.reshape(-1)].reshape(N, N, num_heads).transpose(2, 0, 1)

    params = {
        "ln1_g": 1.0 + 0.05 * jax.random.normal(ks[2], (C,), jnp.float32),
        "ln1_b": 0.05 * jax.random.normal(ks[3], (C,), jnp.float32),
        "w_qkv": jax.random.normal(ks[4], (C, 3 * C), jnp.float32) * 0.05,
        "b_qkv": jax.random.normal(ks[5], (3 * C,), jnp.float32) * 0.02,
        "w_proj": jax.random.normal(ks[6], (C, C), jnp.float32) * 0.05,
        "b_proj": jax.random.normal(ks[7], (C,), jnp.float32) * 0.02,
        "rel_bias": rel_bias,
        "ln2_g": 1.0 + 0.05 * jax.random.normal(ks[8], (C,), jnp.float32),
        "ln2_b": 0.05 * jax.random.normal(ks[9], (C,), jnp.float32),
        "w1": jax.random.normal(ks[10], (C, hidden), jnp.float32) * 0.05,
        "b1": jax.random.normal(ks[11], (hidden,), jnp.float32) * 0.02,
        "w2": jax.random.normal(ks[12], (hidden, C), jnp.float32) * 0.05,
        "b2": jax.random.normal(ks[13], (C,), jnp.float32) * 0.02,
    }

    attn_mask = jnp.asarray(_create_shift_mask(H, W, window_size, shift_size))

    y = swin_block_pallas(x, params, H=H, W=W, window_size=window_size,
                          shift_size=shift_size, num_heads=num_heads,
                          attn_mask=attn_mask)
    jax.block_until_ready(y)

    y_ref = swin_block_reference(x, params, H=H, W=W, window_size=window_size,
                                 shift_size=shift_size, num_heads=num_heads,
                                 attn_mask=attn_mask)
    assert y.shape == (B, L, C)
    err = float(jnp.max(jnp.abs(y - y_ref)))
    assert jnp.allclose(y, y_ref, atol=5e-2, rtol=5e-2), \
        f"mismatch vs reference (max abs err {err})"
    print("KERNEL_OK")
</pallas_src>

<mosaic_0001>
module attributes {stable_mosaic.version = 11 : i64} {
  func.func @_window_attn_kernel(%arg0: i32, %arg1: memref<4x16x128xf32, #tpu.memory_space<vmem>>, %arg2: memref<4x16x1xf32, #tpu.memory_space<vmem>>, %arg3: memref<1x128xf32, #tpu.memory_space<vmem>>, %arg4: memref<1x128xf32, #tpu.memory_space<vmem>>, %arg5: memref<128x96xbf16, #tpu.memory_space<vmem>>, %arg6: memref<1x96xf32, #tpu.memory_space<vmem>>, %arg7: memref<32x128xbf16, #tpu.memory_space<vmem>>, %arg8: memref<1x128xf32, #tpu.memory_space<vmem>>, %arg9: memref<4x16x16xf32, #tpu.memory_space<vmem>>, %arg10: memref<4x16x16xf32, #tpu.memory_space<vmem>>, %arg11: memref<4x16x128xf32, #tpu.memory_space<vmem>>) attributes {dimension_semantics = [#tpu.dimension_semantics<parallel>], iteration_bounds = array<i64: 2>, scalar_prefetch = 0 : i64, scratch_operands = 0 : i64, tpu.core_type = #tpu.core_type<tc>, window_params = [{transform_indices = @transform_0, window_bounds = array<i64: 4, 16, 128>}, {transform_indices = @transform_1, window_bounds = array<i64: 4, 16, 1>}, {pipeline_mode = #tpu.pipeline_mode<synchronous>, transform_indices = @transform_2, window_bounds = array<i64: 1, 128>}, {pipeline_mode = #tpu.pipeline_mode<synchronous>, transform_indices = @transform_3, window_bounds = array<i64: 1, 128>}, {pipeline_mode = #tpu.pipeline_mode<synchronous>, transform_indices = @transform_4, window_bounds = array<i64: 128, 96>}, {pipeline_mode = #tpu.pipeline_mode<synchronous>, transform_indices = @transform_5, window_bounds = array<i64: 1, 96>}, {pipeline_mode = #tpu.pipeline_mode<synchronous>, transform_indices = @transform_6, window_bounds = array<i64: 32, 128>}, {pipeline_mode = #tpu.pipeline_mode<synchronous>, transform_indices = @transform_7, window_bounds = array<i64: 1, 128>}, {pipeline_mode = #tpu.pipeline_mode<synchronous>, transform_indices = @transform_8, window_bounds = array<i64: 4, 16, 16>}, {transform_indices = @transform_9, window_bounds = array<i64: 4, 16, 16>}, {transform_indices = @transform_10, window_bounds = array<i64: 4, 16, 128>}]} {
    %c0 = arith.constant 0 : index
    %c0_0 = arith.constant 0 : index
    %c0_1 = arith.constant 0 : index
    %0 = vector.load %arg1[%c0, %c0_0, %c0_1] : memref<4x16x128xf32, #tpu.memory_space<vmem>>, vector<4x16x128xf32>
    %1 = tpu.iota {dimensions = array<i32: 2>} : vector<4x16x128xi32>
    %c32_i32 = arith.constant 32 : i32
    %2 = vector.broadcast %c32_i32 : i32 to vector<4x16x128xi32>
    %3 = arith.cmpi slt, %1, %2 : vector<4x16x128xi32>
    %cst = arith.constant dense<0.000000e+00> : vector<4x16xf32>
    %4 = vector.multi_reduction <add>, %0, %cst [2] : vector<4x16x128xf32> to vector<4x16xf32>
    %5 = vector.shape_cast %4 : vector<4x16xf32> to vector<4x16x1xf32>
    %cst_2 = arith.constant 3.125000e-02 : f32
    %6 = vector.broadcast %cst_2 : f32 to vector<4x16x1xf32>
    %7 = arith.mulf %5, %6 : vector<4x16x1xf32>
    %8 = vector.broadcast %7 : vector<4x16x1xf32> to vector<4x16x128xf32>
    %9 = arith.subf %0, %8 : vector<4x16x128xf32>
    %cst_3 = arith.constant 0.000000e+00 : f32
    %10 = vector.broadcast %cst_3 : f32 to vector<4x16x128xf32>
    %11 = arith.select %3, %9, %10 : vector<4x16x128xi1>, vector<4x16x128xf32>
    %12 = arith.mulf %11, %11 : vector<4x16x128xf32>
    %cst_4 = arith.constant dense<0.000000e+00> : vector<4x16xf32>
    %13 = vector.multi_reduction <add>, %12, %cst_4 [2] : vector<4x16x128xf32> to vector<4x16xf32>
    %14 = vector.shape_cast %13 : vector<4x16xf32> to vector<4x16x1xf32>
    %cst_5 = arith.constant 3.125000e-02 : f32
    %15 = vector.broadcast %cst_5 : f32 to vector<4x16x1xf32>
    %16 = arith.mulf %14, %15 : vector<4x16x1xf32>
    %cst_6 = arith.constant 9.99999974E-6 : f32
    %17 = vector.broadcast %cst_6 : f32 to vector<4x16x1xf32>
    %18 = arith.addf %16, %17 : vector<4x16x1xf32>
    %19 = math.rsqrt %18 : vector<4x16x1xf32>
    %20 = vector.broadcast %19 : vector<4x16x1xf32> to vector<4x16x128xf32>
    %21 = arith.mulf %11, %20 : vector<4x16x128xf32>
    %c0_7 = arith.constant 0 : index
    %c0_8 = arith.constant 0 : index
    %22 = vector.load %arg3[%c0_7, %c0_8] : memref<1x128xf32, #tpu.memory_space<vmem>>, vector<1x128xf32>
    %23 = vector.shape_cast %22 : vector<1x128xf32> to vector<1x1x128xf32>
    %24 = vector.broadcast %23 : vector<1x1x128xf32> to vector<4x16x128xf32>
    %25 = arith.mulf %21, %24 : vector<4x16x128xf32>
    %c0_9 = arith.constant 0 : index
    %c0_10 = arith.constant 0 : index
    %26 = vector.load %arg4[%c0_9, %c0_10] : memref<1x128xf32, #tpu.memory_space<vmem>>, vector<1x128xf32>
    %27 = vector.shape_cast %26 : vector<1x128xf32> to vector<1x1x128xf32>
    %28 = vector.broadcast %27 : vector<1x1x128xf32> to vector<4x16x128xf32>
    %29 = arith.addf %25, %28 : vector<4x16x128xf32>
    %c0_11 = arith.constant 0 : index
    %c0_12 = arith.constant 0 : index
    %c0_13 = arith.constant 0 : index
    %30 = vector.load %arg2[%c0_11, %c0_12, %c0_13] : memref<4x16x1xf32, #tpu.memory_space<vmem>>, vector<4x16x1xf32>
    %31 = vector.broadcast %30 : vector<4x16x1xf32> to vector<4x16x128xf32>
    %32 = arith.mulf %29, %31 : vector<4x16x128xf32>
    %33 = vector.shape_cast %32 : vector<4x16x128xf32> to vector<64x128xf32>
    %34 = arith.truncf %33 : vector<64x128xf32> to vector<64x128xbf16>
    %c0_14 = arith.constant 0 : index
    %c0_15 = arith.constant 0 : index
    %35 = vector.load %arg5[%c0_14, %c0_15] : memref<128x96xbf16, #tpu.memory_space<vmem>>, vector<128x96xbf16>
    %cst_16 = arith.constant dense<0.000000e+00> : vector<64x96xf32>
    %36 = tpu.matmul %34, %35, %cst_16 {dimension_numbers = #tpu.dot_dimension_numbers<[1], [0], [0], [1], [0, 0, 1, 1], [], []>} : vector<64x128xbf16>, vector<128x96xbf16>, vector<64x96xf32> -> vector<64x96xf32>
    %c0_17 = arith.constant 0 : index
    %c0_18 = arith.constant 0 : index
    %37 = vector.load %arg6[%c0_17, %c0_18] : memref<1x96xf32, #tpu.memory_space<vmem>>, vector<1x96xf32>
    %38 = vector.broadcast %37 : vector<1x96xf32> to vector<64x96xf32>
    %39 = arith.addf %36, %38 : vector<64x96xf32>
    %c0_19 = arith.constant 0 : index
    %c0_20 = arith.constant 0 : index
    %c0_21 = arith.constant 0 : index
    %40 = vector.load %arg10[%c0_19, %c0_20, %c0_21] : memref<4x16x16xf32, #tpu.memory_space<vmem>>, vector<4x16x16xf32>
    %cst_22 = arith.constant 0.000000e+00 : f32
    %41 = vector.broadcast %cst_22 : f32 to vector<64x128xf32>
    %42 = vector.extract_strided_slice %39 {offsets = [0, 0], sizes = [64, 8], strides = [1, 1]} : vector<64x96xf32> to vector<64x8xf32>
    %cst_23 = arith.constant 0.353553385 : f32
    %43 = vector.broadcast %cst_23 : f32 to vector<64x8xf32>
    %44 = arith.mulf %42, %43 : vector<64x8xf32>
    %45 = vector.extract_strided_slice %39 {offsets = [0, 32], sizes = [64, 8], strides = [1, 1]} : vector<64x96xf32> to vector<64x8xf32>
    %46 = vector.extract_strided_slice %39 {offsets = [0, 64], sizes = [64, 8], strides = [1, 1]} : vector<64x96xf32> to vector<64x8xf32>
    %47 = vector.shape_cast %44 : vector<64x8xf32> to vector<4x16x8xf32>
    %48 = vector.shape_cast %45 : vector<64x8xf32> to vector<4x16x8xf32>
    %49 = vector.shape_cast %46 : vector<64x8xf32> to vector<4x16x8xf32>
    %50 = arith.truncf %47 : vector<4x16x8xf32> to vector<4x16x8xbf16>
    %51 = arith.truncf %48 : vector<4x16x8xf32> to vector<4x16x8xbf16>
    "tpu.trace_start"() <{level = 10 : i32, message = "wnd,wmd->wnm"}> : () -> ()
    %cst_24 = arith.constant dense<0.000000e+00> : vector<4x16x16xf32>
    %52 = tpu.matmul %50, %51, %cst_24 {dimension_numbers = #tpu.dot_dimension_numbers<[2], [2], [1], [1], [0, 0, 0, 1, 1, 1], [0], [0]>} : vector<4x16x8xbf16>, vector<4x16x8xbf16>, vector<4x16x16xf32> -> vector<4x16x16xf32>
    "tpu.trace_stop"() : () -> ()
    %c0_25 = arith.constant 0 : index
    %c0_26 = arith.constant 0 : index
    %c0_27 = arith.constant 0 : index
    %53 = vector.load %arg9[%c0_25, %c0_26, %c0_27] : memref<4x16x16xf32, #tpu.memory_space<vmem>>, vector<1x16x16xf32>
    %54 = vector.shape_cast %53 : vector<1x16x16xf32> to vector<16x16xf32>
    %55 = vector.shape_cast %54 : vector<16x16xf32> to vector<1x16x16xf32>
    %56 = vector.broadcast %55 : vector<1x16x16xf32> to vector<4x16x16xf32>
    %57 = arith.addf %52, %56 : vector<4x16x16xf32>
    %58 = arith.addf %57, %40 : vector<4x16x16xf32>
    %cst_28 = arith.constant dense<0xFF800000> : vector<4x16xf32>
    %59 = vector.multi_reduction <maximumf>, %58, %cst_28 [2] : vector<4x16x16xf32> to vector<4x16xf32>
    %60 = vector.shape_cast %59 : vector<4x16xf32> to vector<4x16x1xf32>
    %61 = vector.broadcast %60 : vector<4x16x1xf32> to vector<4x16x16xf32>
    %62 = arith.subf %58, %61 : vector<4x16x16xf32>
    %63 = math.exp %62 : vector<4x16x16xf32>
    %cst_29 = arith.constant dense<0.000000e+00> : vector<4x16xf32>
    %64 = vector.multi_reduction <add>, %63, %cst_29 [2] : vector<4x16x16xf32> to vector<4x16xf32>
    %65 = vector.shape_cast %64 : vector<4x16xf32> to vector<4x16x1xf32>
    %66 = tpu.reciprocal %65 {approx = true} : vector<4x16x1xf32> -> vector<4x16x1xf32>
    %67 = vector.broadcast %66 : vector<4x16x1xf32> to vector<4x16x16xf32>
    %68 = arith.mulf %63, %67 : vector<4x16x16xf32>
    %69 = arith.truncf %68 : vector<4x16x16xf32> to vector<4x16x16xbf16>
    %70 = arith.truncf %49 : vector<4x16x8xf32> to vector<4x16x8xbf16>
    "tpu.trace_start"() <{level = 10 : i32, message = "wnm,wmd->wnd"}> : () -> ()
    %cst_30 = arith.constant dense<0.000000e+00> : vector<4x16x8xf32>
    %71 = tpu.matmul %69, %70, %cst_30 {dimension_numbers = #tpu.dot_dimension_numbers<[2], [1], [1], [2], [0, 0, 0, 1, 1, 2], [0], [0]>} : vector<4x16x16xbf16>, vector<4x16x8xbf16>, vector<4x16x8xf32> -> vector<4x16x8xf32>
    "tpu.trace_stop"() : () -> ()
    %72 = vector.shape_cast %71 : vector<4x16x8xf32> to vector<64x8xf32>
    %73 = arith.truncf %72 : vector<64x8xf32> to vector<64x8xbf16>
    %c0_31 = arith.constant 0 : index
    %c0_32 = arith.constant 0 : index
    %74 = vector.load %arg7[%c0_31, %c0_32] : memref<32x128xbf16, #tpu.memory_space<vmem>>, vector<8x128xbf16>
    %cst_33 = arith.constant dense<0.000000e+00> : vector<64x128xf32>
    %75 = tpu.matmul %73, %74, %cst_33 {dimension_numbers = #tpu.dot_dimension_numbers<[1], [0], [0], [1], [0, 0, 1, 1], [], []>} : vector<64x8xbf16>, vector<8x128xbf16>, vector<64x128xf32> -> vector<64x128xf32>
    %76 = arith.addf %41, %75 : vector<64x128xf32>
    %77 = vector.extract_strided_slice %39 {offsets = [0, 8], sizes = [64, 8], strides = [1, 1]} : vector<64x96xf32> to vector<64x8xf32>
    %cst_34 = arith.constant 0.353553385 : f32
    %78 = vector.broadcast %cst_34 : f32 to vector<64x8xf32>
    %79 = arith.mulf %77, %78 : vector<64x8xf32>
    %80 = vector.extract_strided_slice %39 {offsets = [0, 40], sizes = [64, 8], strides = [1, 1]} : vector<64x96xf32> to vector<64x8xf32>
    %81 = vector.extract_strided_slice %39 {offsets = [0, 72], sizes = [64, 8], strides = [1, 1]} : vector<64x96xf32> to vector<64x8xf32>
    %82 = vector.shape_cast %79 : vector<64x8xf32> to vector<4x16x8xf32>
    %83 = vector.shape_cast %80 : vector<64x8xf32> to vector<4x16x8xf32>
    %84 = vector.shape_cast %81 : vector<64x8xf32> to vector<4x16x8xf32>
    %85 = arith.truncf %82 : vector<4x16x8xf32> to vector<4x16x8xbf16>
    %86 = arith.truncf %83 : vector<4x16x8xf32> to vector<4x16x8xbf16>
    "tpu.trace_start"() <{level = 10 : i32, message = "wnd,wmd->wnm"}> : () -> ()
    %cst_35 = arith.constant dense<0.000000e+00> : vector<4x16x16xf32>
    %87 = tpu.matmul %85, %86, %cst_35 {dimension_numbers = #tpu.dot_dimension_numbers<[2], [2], [1], [1], [0, 0, 0, 1, 1, 1], [0], [0]>} : vector<4x16x8xbf16>, vector<4x16x8xbf16>, vector<4x16x16xf32> -> vector<4x16x16xf32>
    "tpu.trace_stop"() : () -> ()
    %c1 = arith.constant 1 : index
    %c0_36 = arith.constant 0 : index
    %c0_37 = arith.constant 0 : index
    %88 = vector.load %arg9[%c1, %c0_36, %c0_37] : memref<4x16x16xf32, #tpu.memory_space<vmem>>, vector<1x16x16xf32>
    %89 = vector.shape_cast %88 : vector<1x16x16xf32> to vector<16x16xf32>
    %90 = vector.shape_cast %89 : vector<16x16xf32> to vector<1x16x16xf32>
    %91 = vector.broadcast %90 : vector<1x16x16xf32> to vector<4x16x16xf32>
    %92 = arith.addf %87, %91 : vector<4x16x16xf32>
    %93 = arith.addf %92, %40 : vector<4x16x16xf32>
    %cst_38 = arith.constant dense<0xFF800000> : vector<4x16xf32>
    %94 = vector.multi_reduction <maximumf>, %93, %cst_38 [2] : vector<4x16x16xf32> to vector<4x16xf32>
    %95 = vector.shape_cast %94 : vector<4x16xf32> to vector<4x16x1xf32>
    %96 = vector.broadcast %95 : vector<4x16x1xf32> to vector<4x16x16xf32>
    %97 = arith.subf %93, %96 : vector<4x16x16xf32>
    %98 = math.exp %97 : vector<4x16x16xf32>
    %cst_39 = arith.constant dense<0.000000e+00> : vector<4x16xf32>
    %99 = vector.multi_reduction <add>, %98, %cst_39 [2] : vector<4x16x16xf32> to vector<4x16xf32>
    %100 = vector.shape_cast %99 : vector<4x16xf32> to vector<4x16x1xf32>
    %101 = tpu.reciprocal %100 {approx = true} : vector<4x16x1xf32> -> vector<4x16x1xf32>
    %102 = vector.broadcast %101 : vector<4x16x1xf32> to vector<4x16x16xf32>
    %103 = arith.mulf %98, %102 : vector<4x16x16xf32>
    %104 = arith.truncf %103 : vector<4x16x16xf32> to vector<4x16x16xbf16>
    %105 = arith.truncf %84 : vector<4x16x8xf32> to vector<4x16x8xbf16>
    "tpu.trace_start"() <{level = 10 : i32, message = "wnm,wmd->wnd"}> : () -> ()
    %cst_40 = arith.constant dense<0.000000e+00> : vector<4x16x8xf32>
    %106 = tpu.matmul %104, %105, %cst_40 {dimension_numbers = #tpu.dot_dimension_numbers<[2], [1], [1], [2], [0, 0, 0, 1, 1, 2], [0], [0]>} : vector<4x16x16xbf16>, vector<4x16x8xbf16>, vector<4x16x8xf32> -> vector<4x16x8xf32>
    "tpu.trace_stop"() : () -> ()
    %107 = vector.shape_cast %106 : vector<4x16x8xf32> to vector<64x8xf32>
    %108 = arith.truncf %107 : vector<64x8xf32> to vector<64x8xbf16>
    %c8 = arith.constant 8 : index
    %c0_41 = arith.constant 0 : index
    %109 = vector.load %arg7[%c8, %c0_41] : memref<32x128xbf16, #tpu.memory_space<vmem>>, vector<8x128xbf16>
    %cst_42 = arith.constant dense<0.000000e+00> : vector<64x128xf32>
    %110 = tpu.matmul %108, %109, %cst_42 {dimension_numbers = #tpu.dot_dimension_numbers<[1], [0], [0], [1], [0, 0, 1, 1], [], []>} : vector<64x8xbf16>, vector<8x128xbf16>, vector<64x128xf32> -> vector<64x128xf32>
    %111 = arith.addf %76, %110 : vector<64x128xf32>
    %112 = vector.extract_strided_slice %39 {offsets = [0, 16], sizes = [64, 8], strides = [1, 1]} : vector<64x96xf32> to vector<64x8xf32>
    %cst_43 = arith.constant 0.353553385 : f32
    %113 = vector.broadcast %cst_43 : f32 to vector<64x8xf32>
    %114 = arith.mulf %112, %113 : vector<64x8xf32>
    %115 = vector.extract_strided_slice %39 {offsets = [0, 48], sizes = [64, 8], strides = [1, 1]} : vector<64x96xf32> to vector<64x8xf32>
    %116 = vector.extract_strided_slice %39 {offsets = [0, 80], sizes = [64, 8], strides = [1, 1]} : vector<64x96xf32> to vector<64x8xf32>
    %117 = vector.shape_cast %114 : vector<64x8xf32> to vector<4x16x8xf32>
    %118 = vector.shape_cast %115 : vector<64x8xf32> to vector<4x16x8xf32>
    %119 = vector.shape_cast %116 : vector<64x8xf32> to vector<4x16x8xf32>
    %120 = arith.truncf %117 : vector<4x16x8xf32> to vector<4x16x8xbf16>
    %121 = arith.truncf %118 : vector<4x16x8xf32> to vector<4x16x8xbf16>
    "tpu.trace_start"() <{level = 10 : i32, message = "wnd,wmd->wnm"}> : () -> ()
    %cst_44 = arith.constant dense<0.000000e+00> : vector<4x16x16xf32>
    %122 = tpu.matmul %120, %121, %cst_44 {dimension_numbers = #tpu.dot_dimension_numbers<[2], [2], [1], [1], [0, 0, 0, 1, 1, 1], [0], [0]>} : vector<4x16x8xbf16>, vector<4x16x8xbf16>, vector<4x16x16xf32> -> vector<4x16x16xf32>
    "tpu.trace_stop"() : () -> ()
    %c2 = arith.constant 2 : index
    %c0_45 = arith.constant 0 : index
    %c0_46 = arith.constant 0 : index
    %123 = vector.load %arg9[%c2, %c0_45, %c0_46] : memref<4x16x16xf32, #tpu.memory_space<vmem>>, vector<1x16x16xf32>
    %124 = vector.shape_cast %123 : vector<1x16x16xf32> to vector<16x16xf32>
    %125 = vector.shape_cast %124 : vector<16x16xf32> to vector<1x16x16xf32>
    %126 = vector.broadcast %125 : vector<1x16x16xf32> to vector<4x16x16xf32>
    %127 = arith.addf %122, %126 : vector<4x16x16xf32>
    %128 = arith.addf %127, %40 : vector<4x16x16xf32>
    %cst_47 = arith.constant dense<0xFF800000> : vector<4x16xf32>
    %129 = vector.multi_reduction <maximumf>, %128, %cst_47 [2] : vector<4x16x16xf32> to vector<4x16xf32>
    %130 = vector.shape_cast %129 : vector<4x16xf32> to vector<4x16x1xf32>
    %131 = vector.broadcast %130 : vector<4x16x1xf32> to vector<4x16x16xf32>
    %132 = arith.subf %128, %131 : vector<4x16x16xf32>
    %133 = math.exp %132 : vector<4x16x16xf32>
    %cst_48 = arith.constant dense<0.000000e+00> : vector<4x16xf32>
    %134 = vector.multi_reduction <add>, %133, %cst_48 [2] : vector<4x16x16xf32> to vector<4x16xf32>
    %135 = vector.shape_cast %134 : vector<4x16xf32> to vector<4x16x1xf32>
    %136 = tpu.reciprocal %135 {approx = true} : vector<4x16x1xf32> -> vector<4x16x1xf32>
    %137 = vector.broadcast %136 : vector<4x16x1xf32> to vector<4x16x16xf32>
    %138 = arith.mulf %133, %137 : vector<4x16x16xf32>
    %139 = arith.truncf %138 : vector<4x16x16xf32> to vector<4x16x16xbf16>
    %140 = arith.truncf %119 : vector<4x16x8xf32> to vector<4x16x8xbf16>
    "tpu.trace_start"() <{level = 10 : i32, message = "wnm,wmd->wnd"}> : () -> ()
    %cst_49 = arith.constant dense<0.000000e+00> : vector<4x16x8xf32>
    %141 = tpu.matmul %139, %140, %cst_49 {dimension_numbers = #tpu.dot_dimension_numbers<[2], [1], [1], [2], [0, 0, 0, 1, 1, 2], [0], [0]>} : vector<4x16x16xbf16>, vector<4x16x8xbf16>, vector<4x16x8xf32> -> vector<4x16x8xf32>
    "tpu.trace_stop"() : () -> ()
    %142 = vector.shape_cast %141 : vector<4x16x8xf32> to vector<64x8xf32>
    %143 = arith.truncf %142 : vector<64x8xf32> to vector<64x8xbf16>
    %c16 = arith.constant 16 : index
    %c0_50 = arith.constant 0 : index
    %144 = vector.load %arg7[%c16, %c0_50] : memref<32x128xbf16, #tpu.memory_space<vmem>>, vector<8x128xbf16>
    %cst_51 = arith.constant dense<0.000000e+00> : vector<64x128xf32>
    %145 = tpu.matmul %143, %144, %cst_51 {dimension_numbers = #tpu.dot_dimension_numbers<[1], [0], [0], [1], [0, 0, 1, 1], [], []>} : vector<64x8xbf16>, vector<8x128xbf16>, vector<64x128xf32> -> vector<64x128xf32>
    %146 = arith.addf %111, %145 : vector<64x128xf32>
    %147 = vector.extract_strided_slice %39 {offsets = [0, 24], sizes = [64, 8], strides = [1, 1]} : vector<64x96xf32> to vector<64x8xf32>
    %cst_52 = arith.constant 0.353553385 : f32
    %148 = vector.broadcast %cst_52 : f32 to vector<64x8xf32>
    %149 = arith.mulf %147, %148 : vector<64x8xf32>
    %150 = vector.extract_strided_slice %39 {offsets = [0, 56], sizes = [64, 8], strides = [1, 1]} : vector<64x96xf32> to vector<64x8xf32>
    %151 = vector.extract_strided_slice %39 {offsets = [0, 88], sizes = [64, 8], strides = [1, 1]} : vector<64x96xf32> to vector<64x8xf32>
    %152 = vector.shape_cast %149 : vector<64x8xf32> to vector<4x16x8xf32>
    %153 = vector.shape_cast %150 : vector<64x8xf32> to vector<4x16x8xf32>
    %154 = vector.shape_cast %151 : vector<64x8xf32> to vector<4x16x8xf32>
    %155 = arith.truncf %152 : vector<4x16x8xf32> to vector<4x16x8xbf16>
    %156 = arith.truncf %153 : vector<4x16x8xf32> to vector<4x16x8xbf16>
    "tpu.trace_start"() <{level = 10 : i32, message = "wnd,wmd->wnm"}> : () -> ()
    %cst_53 = arith.constant dense<0.000000e+00> : vector<4x16x16xf32>
    %157 = tpu.matmul %155, %156, %cst_53 {dimension_numbers = #tpu.dot_dimension_numbers<[2], [2], [1], [1], [0, 0, 0, 1, 1, 1], [0], [0]>} : vector<4x16x8xbf16>, vector<4x16x8xbf16>, vector<4x16x16xf32> -> vector<4x16x16xf32>
    "tpu.trace_stop"() : () -> ()
    %c3 = arith.constant 3 : index
    %c0_54 = arith.constant 0 : index
    %c0_55 = arith.constant 0 : index
    %158 = vector.load %arg9[%c3, %c0_54, %c0_55] : memref<4x16x16xf32, #tpu.memory_space<vmem>>, vector<1x16x16xf32>
    %159 = vector.shape_cast %158 : vector<1x16x16xf32> to vector<16x16xf32>
    %160 = vector.shape_cast %159 : vector<16x16xf32> to vector<1x16x16xf32>
    %161 = vector.broadcast %160 : vector<1x16x16xf32> to vector<4x16x16xf32>
    %162 = arith.addf %157, %161 : vector<4x16x16xf32>
    %163 = arith.addf %162, %40 : vector<4x16x16xf32>
    %cst_56 = arith.constant dense<0xFF800000> : vector<4x16xf32>
    %164 = vector.multi_reduction <maximumf>, %163, %cst_56 [2] : vector<4x16x16xf32> to vector<4x16xf32>
    %165 = vector.shape_cast %164 : vector<4x16xf32> to vector<4x16x1xf32>
    %166 = vector.broadcast %165 : vector<4x16x1xf32> to vector<4x16x16xf32>
    %167 = arith.subf %163, %166 : vector<4x16x16xf32>
    %168 = math.exp %167 : vector<4x16x16xf32>
    %cst_57 = arith.constant dense<0.000000e+00> : vector<4x16xf32>
    %169 = vector.multi_reduction <add>, %168, %cst_57 [2] : vector<4x16x16xf32> to vector<4x16xf32>
    %170 = vector.shape_cast %169 : vector<4x16xf32> to vector<4x16x1xf32>
    %171 = tpu.reciprocal %170 {approx = true} : vector<4x16x1xf32> -> vector<4x16x1xf32>
    %172 = vector.broadcast %171 : vector<4x16x1xf32> to vector<4x16x16xf32>
    %173 = arith.mulf %168, %172 : vector<4x16x16xf32>
    %174 = arith.truncf %173 : vector<4x16x16xf32> to vector<4x16x16xbf16>
    %175 = arith.truncf %154 : vector<4x16x8xf32> to vector<4x16x8xbf16>
    "tpu.trace_start"() <{level = 10 : i32, message = "wnm,wmd->wnd"}> : () -> ()
    %cst_58 = arith.constant dense<0.000000e+00> : vector<4x16x8xf32>
    %176 = tpu.matmul %174, %175, %cst_58 {dimension_numbers = #tpu.dot_dimension_numbers<[2], [1], [1], [2], [0, 0, 0, 1, 1, 2], [0], [0]>} : vector<4x16x16xbf16>, vector<4x16x8xbf16>, vector<4x16x8xf32> -> vector<4x16x8xf32>
    "tpu.trace_stop"() : () -> ()
    %177 = vector.shape_cast %176 : vector<4x16x8xf32> to vector<64x8xf32>
    %178 = arith.truncf %177 : vector<64x8xf32> to vector<64x8xbf16>
    %c24 = arith.constant 24 : index
    %c0_59 = arith.constant 0 : index
    %179 = vector.load %arg7[%c24, %c0_59] : memref<32x128xbf16, #tpu.memory_space<vmem>>, vector<8x128xbf16>
    %cst_60 = arith.constant dense<0.000000e+00> : vector<64x128xf32>
    %180 = tpu.matmul %178, %179, %cst_60 {dimension_numbers = #tpu.dot_dimension_numbers<[1], [0], [0], [1], [0, 0, 1, 1], [], []>} : vector<64x8xbf16>, vector<8x128xbf16>, vector<64x128xf32> -> vector<64x128xf32>
    %181 = arith.addf %146, %180 : vector<64x128xf32>
    %c0_61 = arith.constant 0 : index
    %c0_62 = arith.constant 0 : index
    %182 = vector.load %arg8[%c0_61, %c0_62] : memref<1x128xf32, #tpu.memory_space<vmem>>, vector<1x128xf32>
    %183 = vector.broadcast %182 : vector<1x128xf32> to vector<64x128xf32>
    %184 = arith.addf %181, %183 : vector<64x128xf32>
    %185 = vector.shape_cast %184 : vector<64x128xf32> to vector<4x16x128xf32>
    %c0_63 = arith.constant 0 : index
    %c0_64 = arith.constant 0 : index
    %c0_65 = arith.constant 0 : index
    %186 = vector.load %arg11[%c0_63, %c0_64, %c0_65] : memref<4x16x128xf32, #tpu.memory_space<vmem>>, vector<4x16x128xf32>
    tpu.vector_store %arg11[%c0_63, %c0_64, %c0_65], %185 {strides = array<i32>} : memref<4x16x128xf32, #tpu.memory_space<vmem>>, vector<4x16x128xf32>,
    return
  }
  func.func @transform_0(%arg0: i32) -> (i32, i32, i32) {
    %c0_i32 = arith.constant 0 : i32
    %c0_i32_0 = arith.constant 0 : i32
    %c0_i32_1 = arith.constant 0 : i32
    return %arg0, %c0_i32, %c0_i32_0 : i32, i32, i32
  }
  func.func @transform_1(%arg0: i32) -> (i32, i32, i32) {
    %c0_i32 = arith.constant 0 : i32
    %c0_i32_0 = arith.constant 0 : i32
    %c0_i32_1 = arith.constant 0 : i32
    return %arg0, %c0_i32, %c0_i32_0 : i32, i32, i32
  }
  func.func @transform_2(%arg0: i32) -> (i32, i32) {
    %c0_i32 = arith.constant 0 : i32
    %c0_i32_0 = arith.constant 0 : i32
    %c0_i32_1 = arith.constant 0 : i32
    return %c0_i32, %c0_i32_0 : i32, i32
  }
  func.func @transform_3(%arg0: i32) -> (i32, i32) {
    %c0_i32 = arith.constant 0 : i32
    %c0_i32_0 = arith.constant 0 : i32
    %c0_i32_1 = arith.constant 0 : i32
    return %c0_i32, %c0_i32_0 : i32, i32
  }
  func.func @transform_4(%arg0: i32) -> (i32, i32) {
    %c0_i32 = arith.constant 0 : i32
    %c0_i32_0 = arith.constant 0 : i32
    %c0_i32_1 = arith.constant 0 : i32
    return %c0_i32, %c0_i32_0 : i32, i32
  }
  func.func @transform_5(%arg0: i32) -> (i32, i32) {
    %c0_i32 = arith.constant 0 : i32
    %c0_i32_0 = arith.constant 0 : i32
    %c0_i32_1 = arith.constant 0 : i32
    return %c0_i32, %c0_i32_0 : i32, i32
  }
  func.func @transform_6(%arg0: i32) -> (i32, i32) {
    %c0_i32 = arith.constant 0 : i32
    %c0_i32_0 = arith.constant 0 : i32
    %c0_i32_1 = arith.constant 0 : i32
    return %c0_i32, %c0_i32_0 : i32, i32
  }
  func.func @transform_7(%arg0: i32) -> (i32, i32) {
    %c0_i32 = arith.constant 0 : i32
    %c0_i32_0 = arith.constant 0 : i32
    %c0_i32_1 = arith.constant 0 : i32
    return %c0_i32, %c0_i32_0 : i32, i32
  }
  func.func @transform_8(%arg0: i32) -> (i32, i32, i32) {
    %c0_i32 = arith.constant 0 : i32
    %c0_i32_0 = arith.constant 0 : i32
    %c0_i32_1 = arith.constant 0 : i32
    %c0_i32_2 = arith.constant 0 : i32
    return %c0_i32, %c0_i32_0, %c0_i32_1 : i32, i32, i32
  }
  func.func @transform_9(%arg0: i32) -> (i32, i32, i32) {
    %c1_i32 = arith.constant 1 : i32
    %c0_i32 = arith.constant 0 : i32
    %0 = arith.cmpi eq, %c1_i32, %c0_i32 : i32
    %c1_i32_0 = arith.constant 1 : i32
    %1 = arith.select %0, %c1_i32_0, %c1_i32 : i32
    %2 = arith.remsi %arg0, %1 : i32
    %c0_i32_1 = arith.constant 0 : i32
    %3 = arith.cmpi ne, %2, %c0_i32_1 : i32
    %c0_i32_2 = arith.constant 0 : i32
    %4 = arith.cmpi slt, %2, %c0_i32_2 : i32
    %c0_i32_3 = arith.constant 0 : i32
    %5 = arith.cmpi slt, %1, %c0_i32_3 : i32
    %6 = arith.xori %4, %5 : i1
    %7 = arith.andi %6, %3 : i1
    %8 = arith.addi %2, %1 : i32
    %9 = arith.select %7, %8, %2 : i32
    %c0_i32_4 = arith.constant 0 : i32
    %c0_i32_5 = arith.constant 0 : i32
    %c0_i32_6 = arith.constant 0 : i32
    return %9, %c0_i32_4, %c0_i32_5 : i32, i32, i32
  }
  func.func @transform_10(%arg0: i32) -> (i32, i32, i32) {
    %c0_i32 = arith.constant 0 : i32
    %c0_i32_0 = arith.constant 0 : i32
    %c0_i32_1 = arith.constant 0 : i32
    return %arg0, %c0_i32, %c0_i32_0 : i32, i32, i32
  }
}

</mosaic_0001>

<bundles_post_ra>
// kernel: tpu_custom_call.1
= control target key start
LH: loop header
LB: loop body
LE: loop exit
PB: predicated region body
PF: predicated region fallthrough
CT: control target
= control target key end

     0   :  { %15 = vsyncpa [#allocation3], 0  ;;  %s4938_s0 = inlined_call_operand.vmem [shape: f32[8,16,128], index: 0, kind: input, shape index: {}]   ;;  %s4939_s1 = inlined_call_operand.vmem [shape: f32[8,16,1], index: 1, kind: input, shape index: {}]   ;;  %s4940_s2 = inlined_call_operand.vmem [shape: f32[1,128], index: 2, kind: input, shape index: {}]   ;;  %s4941_s3 = inlined_call_operand.vmem [shape: f32[1,128], index: 3, kind: input, shape index: {}]   ;;  %s4942_s4 = inlined_call_operand.vmem [shape: bf16[128,96], index: 4, kind: input, shape index: {}]   ;;  %s4943_s5 = inlined_call_operand.vmem [shape: f32[1,96], index: 5, kind: input, shape index: {}]   ;;  %s4944_s6 = inlined_call_operand.hbm [shape: bf16[32,128], index: 6, kind: input, shape index: {}]   ;;  %s4945_s7 = inlined_call_operand.vmem [shape: f32[1,128], index: 7, kind: input, shape index: {}]   ;;  %s4946_s8 = inlined_call_operand.vmem [shape: f32[4,16,16], index: 8, kind: input, shape index: {}]   ;;  %s4947_s9 = inlined_call_operand.vmem [shape: f32[4,16,16], index: 9, kind: input, shape index: {}]   ;;  %s4948_s10 = inlined_call_operand.hbm [shape: f32[8,16,128], index: 10, kind: output, shape index: {}]  }
   0x1   :  { %16 = vsyncpa [#allocation4], 0 }
   0x2   :  { %18 = vsyncpa [#allocation4 + $0x1], 0  ;;  %s4094_s13 = smov 0   ;;  %s4096_s14 = smov 0  }
   0x3   :  { %s4098_s15 = smov 0   ;;  %s4100_s16 = smov 0  }
   0x4 LB: > { %s4115_s17 = sadd.s32 4294967295, %s4017_s16   ;;  %s3224_s18 = sadd.s32 4294967294, %s4017_s16   ;;  %s4017_s16 = sphi %s4100_s16, %s4964_s16   ;;  %s4013_s15 = sphi %s4098_s15, %s4963_s15   ;;  %s4009_s14 = sphi %s4096_s14, %s4962_s14   ;;  %s4005_s13 = sphi %s4094_s13, %s4961_s13  }
   0x5   : > { %s4119_s19 = sadd.s32 1, %s4017_s16   ;;  %s251_s20 = sadd.s32 1, %s4013_s15 }
   0x6   : > { %s248_s21 = ssub.s32 %s4017_s16, %s4119_s19  ;;  %p261_p0 = scmp.ne.s32.totalorder %s4013_s15, %s4009_s14 }
   0x7   : > { %p249_p1 = scmp.eq.s32.totalorder %s248_s21, 0  ;;  %p262_p2 = scmp.eq.s32.totalorder %s4115_s17, 1 }
   0x8   : > { %p267_p3 = scmp.ne.s32.totalorder %s4009_s14, %s4005_s13  ;;  %p268_p4 = scmp.eq.s32.totalorder %s3224_s18, 1 }
   0x9   : > { %s4130_s22 = scalar_select %p249_p1, %s4013_s15, %s251_s20  }
   0xa   : > { %p4132_p5 = por %p262_p2, %p261_p0  ;;  %p4136_p6 = por %p268_p4, %p267_p3 }
   0xb   : > { %p3225_p7 = scmp.ge.s32.totalorder %s4017_s16, 1  ;;  %p275_p8 = scmp.lt.s32.totalorder %s4017_s16, 3 }
   0xc   : > { %s4952_s23 = scalar_select %p4132_p5, 1, 0 }
   0xd   : > { %s4953_s24 = scalar_select %p4136_p6, 1, 0 }
   0xe   : > { %p4949_p9 = scmp.eq.s32.totalorder %s4115_s17, 0  ;;  %p4143_p10 = pnand %p3225_p7, %p275_p8 }
   0xf   : > { %s4019_s26 = smov [#allocation2]   ;;  %s3923_s11 = scalar_lea.hbm %s4944_s6, 256 }
  0x10   : > { %s4954_s25 = scalar_select %p4143_p10, 1, 0 }
  0x11   : > { %s299_s27 = sshll.u32 %s4019_s26, 4  ;;  %p3699_p11 = pneg %p4143_p10  ;;  %s300_s27 = int_to_ptr.vmem [resolvable:$true] %s299_s27 }
  0x12   : > { %p3924_p13 = scmp.ne.s32.totalorder %s4944_s6, %s3923_s11  ;;  %p3930_p3 = scmp.lt.u32.totalorder %s3923_s11, %s4944_s6 }
  0x13   : > { %p4151_p12 = pnand %p4949_p9, %p3699_p11 }
  0x15   : > { %p3925_p0 = pneg %p4151_p12 }
  0x17   : > { %p3926_p1 = pnand %p3925_p0, %p3924_p13 }
  0x19   : > { %p3927_p2 = pneg %p3926_p1 }
  0x1b   : > { %p3932_p4 = pnand %p3930_p3, %p3927_p2 }
  0x1d   : > { %3935 = shalt.err (!%p3932_p4)
}
  0x1e   : > { %s3936_s26 = scalar_lea.vmem %s300_s27, 256  ;;  %p3944_p9 = scmp.lt.s32.totalorder %s300_s27, %s300_s27 }
  0x1f   : > { %p3937_p7 = scmp.ne.s32.totalorder %s300_s27, %s3936_s26  ;;  %p3945_p6 = scmp.lt.s32.totalorder %s3936_s26, %s3936_s26 }
  0x21   : > { %p3939_p8 = pnand %p3937_p7, %p3925_p0  ;;  %p3946_p5 = por %p3945_p6, %p3944_p9 }
  0x23   : > { %p3940_p11 = pneg %p3939_p8 }
  0x25   : > { %p3947_p10 = pnand %p3946_p5, %p3940_p11 }
  0x27   : > { %3950 = shalt.err (!%p3947_p10)
}
  0x28   : > { %s4020_s29 = smov 64   ;;  %s4021_s30 = smov 4  }
  0x29   : > { %3702 = dma.hbm_to_vmem [thread:$0]  (!%p4151_p12), %s4944_s6, 256, %s300_s27, [#allocation3], %s4020_s29, %s4020_s29, %s4021_s30  }
  0x2a   : > { %p4956_p13 = scmp.ne.s32.totalorder %s4954_s25, 0 }
  0x2b   : > { %p4957_p1 = scmp.eq.s32.totalorder (!%p4956_p13), %s4115_s17, 0 }
  0x2c   : > { %344 = sbr.rel (%p4956_p13) target bundleno = 3769 (0xeb9), region = 60 }
  0x33   : > { %3996 = dma.done.wait (%p4957_p1), [#allocation3], 256   ;;  %p4958_p0 = pmov %p4957_p1 }
  0x34   : > { %s3231_s11 = sshll.u32 %s4115_s17, 2  ;;  %v4022_v8 = vmov 0   ;;  %v413_v9 = vlaneseq  ;;  %v3763_v46 = vld [vmem:[%s4942_s4] sm:$0xff]   ;;  %v3764_v47 = vld [vmem:[%s4942_s4 + $0x8] sm:$0xff]   ;;  %v3765_v48 = vld [vmem:[%s4942_s4 + $0x10] sm:$0xff]   ;;  %vm4024_vm1 = vmmov 0  }
  0x35   : > { %3998 = vsyncadd (%p4958_p0), [#allocation3], 4294967040  ;;  %p390_p5 = scmp.lt.s32.totalorder %s3231_s11, 7  ;;  %3762 = vset.pattern.permute.xlu1 %v4022_v8  ;;  %3761 = vset.pattern.permute.xlu0 %v4022_v8  ;;  %v3766_v50 = vld [vmem:[%s4942_s4 + $0x18] sm:$0xff]   ;;  %v3767_v52 = vld [vmem:[%s4942_s4 + $0x20] sm:$0xff]   ;;  %s4025_s30 = smov 96  }
  0x36   : > { %v4189_v10 = vand.u32 127, %v413_v9  ;;  %3409 = vmatprep.subr.bf16.mxu0 %v3763_v46  ;;  %v3768_v55 = vld [vmem:[%s4942_s4 + $0x28] sm:$0xff]   ;;  %v3769_v57 = vld [vmem:[%s4942_s4 + $0x30] sm:$0xff]   ;;  %v3770_v59 = vld [vmem:[%s4942_s4 + $0x38] sm:$0xff]   ;;  %vm767_vm2 = vcmask 64512   ;;  %vm973_vm3 = vcmask 130048  }
  0x37   : > { %s4966_s11 = smov (!%p390_p5, %s3231_s11), 7  ;;  %3410 = vmatpush3.bf16.msra.mxu0 %v3763_v46  ;;  %s4026_s18 = smov 64   ;;  %vm1775_vm4 = vcmask 1043456  }
  0x38   : > { %s3309_s28 = sshll.u32 %s4966_s11, 4  ;;  %vm415_vm0 = vcmp.lt.s32.totalorder %v4189_v10, 32  ;;  %3411 = vmatprep.subr.bf16.mxu0 %v3764_v47  ;;  %s4027_s20 = smov 88  }
  0x39   : > { %s394_s25 = scalar_lea.vmem %s4938_s0, %s3309_s28  ;;  %s4028_s27 = smov 120  }
  0x3a   : > { %v405_v0 = vld [vmem:[%s394_s25] sm:$0xff]  ;;  %v407_v1 = vld [vmem:[%s394_s25 + $0x10] sm:$0xff]  ;;  %v406_v2 = vld [vmem:[%s394_s25 + $0x8] sm:$0xff]  ;;  %s4029_s21 = smov 56   ;;  %s4030_s26 = smov 112  }
  0x3b   : > { %416 = vadd.xlane.f32.xlu0 %v405_v0  ;;  %420 = vadd.xlane.f32.xlu1 %v407_v1  ;;  %v408_v3 = vld [vmem:[%s394_s25 + $0x18] sm:$0xff]  ;;  %v409_v4 = vld [vmem:[%s394_s25 + $0x20] sm:$0xff]  ;;  %v410_v5 = vld [vmem:[%s394_s25 + $0x28] sm:$0xff]  ;;  %s4031_s11 = smov 80   ;;  %p4959_p9 = scmp.ne.s32.totalorder %s4952_s23, 0 }
  0x3c   : > { %v411_v6 = vld [vmem:[%s394_s25 + $0x30] sm:$0xff]  ;;  %v4186_v7 = vld [vmem:[%s394_s25 + $0x38] sm:$0xff]  ;;  %3412 = vmatpush3.bf16.msra.mxu0 %v3764_v47  ;;  %s4248_s25 = scalar_lea.vmem %s4939_s1, %s3309_s28  ;;  %s3312_s28 = sshll.u32 %s4115_s17, 10 }
  0x3d   : > { %3413 = vmatprep.subr.bf16.mxu0 %v3765_v48  ;;  %v543_v49 = vld [vmem:[%s4248_s25 + $0x8] sm:$0xff]  ;;  %v544_v51 = vld [vmem:[%s4248_s25 + $0x10] sm:$0xff]  ;;  %v542_v53 = vld [vmem:[%s4248_s25] sm:$0xff] }
  0x3e   : > { %v545_v54 = vld [vmem:[%s4248_s25 + $0x18] sm:$0xff]  ;;  %v546_v56 = vld [vmem:[%s4248_s25 + $0x20] sm:$0xff]  ;;  %v547_v58 = vld [vmem:[%s4248_s25 + $0x28] sm:$0xff] }
  0x3f   : > { %418 = vadd.xlane.f32.xlu0 %v406_v2  ;;  %422 = vadd.xlane.f32.xlu1 %v408_v3  ;;  %v548_v60 = vld [vmem:[%s4248_s25 + $0x30] sm:$0xff] }
  0x40   : > { %3414 = vmatpush3.bf16.msra.mxu0 %v3765_v48 }
  0x41   : > { %3415 = vmatprep.subr.bf16.mxu0 %v3766_v50 }
  0x43   : > { %424 = vadd.xlane.f32.xlu0 %v409_v4  ;;  %426 = vadd.xlane.f32.xlu1 %v410_v5 }
  0x44   : > { %3416 = vmatpush3.bf16.msra.mxu0 %v3766_v50 }
  0x45   : > { %3417 = vmatprep.subr.bf16.mxu0 %v3767_v52 }
  0x47   : > { %428 = vadd.xlane.f32.xlu0 %v411_v6  ;;  %430 = vadd.xlane.f32.xlu1 %v4186_v7 }
  0x48   : > { %3418 = vmatpush3.bf16.msra.mxu0 %v3767_v52 }
  0x49   : > { %3419 = vmatprep.subr.bf16.mxu0 %v3768_v55 }
  0x4c   : > { %3420 = vmatpush3.bf16.msra.mxu0 %v3768_v55 }
  0x4d   : > { %3421 = vmatprep.subr.bf16.mxu0 %v3769_v57 }
  0x50   : > { %3422 = vmatpush3.bf16.msra.mxu0 %v3769_v57 }
  0x51   : > { %3423 = vmatprep.subr.bf16.mxu0 %v3770_v59 }
  0x54   : > { %3424 = vmatpush3.bf16.msra.mxu0 %v3770_v59 }
  0xc8   : > { %v417_v11 = vpop.xlane.xlu0 %416  ;;  %v421_v12 = vpop.xlane.xlu1 %420 }
  0xc9   : > { %v432_v13 = vmul.f32 0.03125, %v417_v11  ;;  %v434_v14 = vmul.f32 0.03125, %v421_v12 }
  0xcb   : > { %v440_v15 = vsub.f32 %v405_v0, %v432_v13  ;;  %v442_v16 = vsub.f32 %v407_v1, %v434_v14 }
  0xcc   : > { %v419_v17 = vpop.xlane.xlu0 %418  ;;  %v423_v18 = vpop.xlane.xlu1 %422 }
  0xcd   : > { %v433_v19 = vmul.f32 0.03125, %v419_v17  ;;  %v435_v20 = vmul.f32 0.03125, %v423_v18  ;;  %v4194_v21 = vsel %vm415_vm0, %v440_v15, 0.0  ;;  %v4198_v22 = vsel %vm415_vm0, %v442_v16, 0.0 }
  0xce   : > { %v456_v23 = vmul.f32 %v4194_v21, %v4194_v21  ;;  %v458_v28 = vmul.f32 %v4198_v22, %v4198_v22 }
  0xcf   : > { %v441_v24 = vsub.f32 %v406_v2, %v433_v19  ;;  %v443_v25 = vsub.f32 %v408_v3, %v435_v20  ;;  %v549_v2 = vld [vmem:[%s4248_s25 + $0x38] sm:$0xff] }
  0xd0   : > { %464 = vadd.xlane.f32.xlu0 %v456_v23  ;;  %v425_v26 = vpop.xlane.xlu0 %424  ;;  %v427_v27 = vpop.xlane.xlu1 %426 }
  0xd1   : > { %v436_v29 = vmul.f32 0.03125, %v425_v26  ;;  %v437_v30 = vmul.f32 0.03125, %v427_v27  ;;  %v4206_v31 = vsel %vm415_vm0, %v441_v24, 0.0  ;;  %v4210_v32 = vsel %vm415_vm0, %v443_v25, 0.0  ;;  %v3237_v24 = vld [vmem:[%s4940_s2] ss:$0 sm:$0xff] }
  0xd2   : > { %v457_v33 = vmul.f32 %v4206_v31, %v4206_v31  ;;  %v459_v37 = vmul.f32 %v4210_v32, %v4210_v32 }
  0xd3   : > { %v444_v34 = vsub.f32 %v409_v4, %v436_v29  ;;  %v445_v35 = vsub.f32 %v410_v5, %v437_v30  ;;  %v3238_v30 = vld [vmem:[%s4941_s3] ss:$0 sm:$0xff] }
  0xd4   : > { %468 = vadd.xlane.f32.xlu0 %v458_v28  ;;  %466 = vadd.xlane.f32.xlu1 %v457_v33  ;;  %v429_v36 = vpop.xlane.xlu0 %428  ;;  %v431_v61 = vpop.xlane.xlu1 %430 }
  0xd5   : > { %v438_v38 = vmul.f32 0.03125, %v429_v36  ;;  %v4218_v39 = vsel %vm415_vm0, %v444_v34, 0.0  ;;  %v4222_v40 = vsel %vm415_vm0, %v445_v35, 0.0  ;;  %v439_v62 = vmul.f32 0.03125, %v431_v61 }
  0xd6   : > { %v460_v41 = vmul.f32 %v4218_v39, %v4218_v39  ;;  %v461_v43 = vmul.f32 %v4222_v40, %v4222_v40 }
  0xd7   : > { %v446_v42 = vsub.f32 %v411_v6, %v438_v38  ;;  %v447_v63 = vsub.f32 %v4186_v7, %v439_v62 }
  0xd8   : > { %470 = vadd.xlane.f32.xlu1 %v459_v37  ;;  %472 = vadd.xlane.f32.xlu0 %v460_v41 }
  0xd9   : > { %v4230_v44 = vsel %vm415_vm0, %v446_v42, 0.0  ;;  %v4275_v0 = vsel %vm415_vm0, %v447_v63, 0.0 }
  0xda   : > { %v462_v45 = vmul.f32 %v4230_v44, %v4230_v44  ;;  %v463_v1 = vmul.f32 %v4275_v0, %v4275_v0 }
  0xdc   : > { %474 = vadd.xlane.f32.xlu1 %v461_v43  ;;  %476 = vadd.xlane.f32.xlu0 %v462_v45 }
  0xed   : > { %557 = vperm.xlu1 %3762, %v543_v49  }
  0xf1   : > { %562 = vperm.xlu1 %3762, %v544_v51  }
  0xf2   : > { %552 = vperm.xlu0 %3761, %v542_v53  }
  0xf5   : > { %567 = vperm.xlu1 %3762, %v545_v54  }
  0xf9   : > { %572 = vperm.xlu1 %3762, %v546_v56  }
  0xfd   : > { %577 = vperm.xlu1 %3762, %v547_v58  }
 0x101   : > { %582 = vperm.xlu1 %3762, %v548_v60  }
 0x125   : > { %478 = vadd.xlane.f32.xlu1 %v463_v1 }
 0x136   : > { %587 = vperm.xlu1 %3762, %v549_v2  }
 0x15d   : > { %v465_v3 = vpop.xlane.xlu0 %464 }
 0x15e   : > { %v480_v4 = vmul.f32 0.03125, %v465_v3 }
 0x160   : > { %v488_v5 = vadd.f32 1e-05, %v480_v4 }
 0x161   : > { %v467_v6 = vpop.xlane.xlu1 %466  ;;  %v469_v8 = vpop.xlane.xlu0 %468 }
 0x162   : > { %3771 = vrsqrt.f32 %v488_v5  ;;  %v481_v9 = vmul.f32 0.03125, %v467_v6  ;;  %v482_v11 = vmul.f32 0.03125, %v469_v8 }
 0x164   : > { %v489_v12 = vadd.f32 1e-05, %v481_v9  ;;  %v490_v7 = vadd.f32 1e-05, %v482_v11 }
 0x165   : > { %v471_v13 = vpop.xlane.xlu1 %470  ;;  %v473_v10 = vpop.xlane.xlu0 %472 }
 0x166   : > { %3773 = vrsqrt.f32 %v489_v12  ;;  %v483_v14 = vmul.f32 0.03125, %v471_v13  ;;  %v484_v15 = vmul.f32 0.03125, %v473_v10 }
 0x167   : > { %3775 = vrsqrt.f32 %v490_v7 }
 0x168   : > { %v491_v16 = vadd.f32 1e-05, %v483_v14  ;;  %v492_v17 = vadd.f32 1e-05, %v484_v15 }
 0x169   : > { %v475_v18 = vpop.xlane.xlu1 %474  ;;  %v477_v29 = vpop.xlane.xlu0 %476 }
 0x16a   : > { %3777 = vrsqrt.f32 %v491_v16  ;;  %v485_v19 = vmul.f32 0.03125, %v475_v18  ;;  %v486_v2 = vmul.f32 0.03125, %v477_v29 }
 0x16b   : > { %3779 = vrsqrt.f32 %v492_v17 }
 0x16c   : > { %v3772_v20 = vpop.eup %3771  ;;  %v493_v23 = vadd.f32 1e-05, %v485_v19  ;;  %v494_v3 = vadd.f32 1e-05, %v486_v2  ;;  %v4023_v19 = vmov 0.0   ;;  %v4354_v2 = vld [vmem:[%s4946_s8] sm:$0xff] }
 0x16d   : > { %v558_v25 = vpop.permute.xlu1 %557  ;;  %v504_v26 = vmul.f32 %v3772_v20, %v4194_v21  ;;  %3433 = vmatprep.subr.bf16.mxu1 %v4023_v19  ;;  %3463 = vmatprep.subr.bf16.mxu0 %v4023_v19 }
 0x16e   : > { %3781 = vrsqrt.f32 %v493_v23  ;;  %3435 = vmatprep.mubr.msk.bf16.mxu1 %vm4024_vm1, %v4023_v19 }
 0x16f   : > { %v519_v27 = vmul.f32 %v3237_v24, %v504_v26  ;;  %3783 = vrsqrt.f32 %v494_v3 }
 0x170   : > { %v3774_v28 = vpop.eup %3773 }
 0x171   : > { %v3776_v33 = vpop.eup %3775  ;;  %v505_v34 = vmul.f32 %v3774_v28, %v4206_v31  ;;  %v563_v35 = vpop.permute.xlu1 %562  ;;  %v534_v38 = vadd.f32 %v3238_v30, %v519_v27 }
 0x172   : > { %v506_v36 = vmul.f32 %v3776_v33, %v4198_v22  ;;  %v553_v43 = vpop.permute.xlu0 %552 }
 0x173   : > { %v520_v37 = vmul.f32 %v3237_v24, %v505_v34  ;;  %v590_v51 = vmul.f32 %v553_v43, %v534_v38 }
 0x174   : > { %v3778_v41 = vpop.eup %3777  ;;  %v521_v42 = vmul.f32 %v3237_v24, %v506_v36 }
 0x175   : > { %v3780_v21 = vpop.eup %3779  ;;  %v535_v45 = vadd.f32 %v3238_v30, %v520_v37  ;;  %v507_v46 = vmul.f32 %v3778_v41, %v4210_v32  ;;  %v568_v47 = vpop.permute.xlu1 %567 }
 0x176   : > { %v508_v48 = vmul.f32 %v3780_v21, %v4218_v39  ;;  %v536_v50 = vadd.f32 %v3238_v30, %v521_v42 }
 0x177   : > { %v591_v49 = vmul.f32 %v558_v25, %v535_v45  ;;  %v522_v52 = vmul.f32 %v3237_v24, %v507_v46 }
 0x178   : > { %v3782_v31 = vpop.eup %3781  ;;  %v523_v53 = vmul.f32 %v3237_v24, %v508_v48  ;;  %v592_v57 = vmul.f32 %v563_v35, %v536_v50 }
 0x179   : > { %v537_v54 = vadd.f32 %v3238_v30, %v522_v52  ;;  %v573_v22 = vpop.permute.xlu1 %572  ;;  %v598_v55 = vpack.c.bf16 %v591_v49, %v590_v51  ;;  %v509_v56 = vmul.f32 %v3782_v31, %v4222_v40  ;;  %v3784_v8 = vpop.eup %3783 }
 0x17a   : > { %v538_v59 = vadd.f32 %v3238_v30, %v523_v53  ;;  %v510_v9 = vmul.f32 %v3784_v8, %v4230_v44  ;;  %v3239_v44 = vld [vmem:[%s4943_s5] ss:$0 sm:$0xff] }
 0x17b   : > { %v593_v58 = vmul.f32 %v568_v47, %v537_v54  ;;  %3425 = vmatprep.mubr.bf16.mxu0 %v598_v55  ;;  %v524_v60 = vmul.f32 %v3237_v24, %v509_v56 }
 0x17c   : > { %v594_v39 = vmul.f32 %v573_v22, %v538_v59  ;;  %v525_v12 = vmul.f32 %v3237_v24, %v510_v9  ;;  %v4370_v9 = vld [vmem:[%s4947_s9 + $0x18] sm:$0xff] }
 0x17d   : > { %v599_v32 = vpack.c.bf16 %v593_v58, %v592_v57  ;;  %v539_v61 = vadd.f32 %v3238_v30, %v524_v60  ;;  %v578_v62 = vpop.permute.xlu1 %577 }
 0x17e   : > { %v540_v10 = vadd.f32 %v3238_v30, %v525_v12 }
 0x17f   : > { %v595_v63 = vmul.f32 %v578_v62, %v539_v61  ;;  %3426 = vmatmul.mubr.bf16.vlgmr.msra.gmra.mrb[0].mxu0 %v599_v32 }
 0x181   : > { %v600_v1 = vpack.c.bf16 %v595_v63, %v594_v39  ;;  %v583_v4 = vpop.permute.xlu1 %582 }
 0x182   : > { %v596_v16 = vmul.f32 %v583_v4, %v540_v10  ;;  %v4359_v4 = vld [vmem:[%s4947_s9 + $0x10] sm:$0xff] }
 0x183   : > { %3429 = vmatprep.mubr.bf16.mxu0 %v600_v1 }
 0x1b2   : > { %v479_v5 = vpop.xlane.xlu1 %478 }
 0x1b3   : > { %v487_v6 = vmul.f32 0.03125, %v479_v5 }
 0x1b5   : > { %v495_v40 = vadd.f32 1e-05, %v487_v6 }
 0x1b6   : > { %v588_v15 = vpop.permute.xlu1 %587 }
 0x1b7   : > { %3785 = vrsqrt.f32 %v495_v40  ;;  %v4365_v40 = vld [vmem:[%s4946_s8 + $0x8] sm:$0xff] }
 0x1c1   : > { %v3786_v11 = vpop.eup %3785 }
 0x1c2   : > { %v511_v7 = vmul.f32 %v3786_v11, %v4275_v0 }
 0x1c4   : > { %v526_v13 = vmul.f32 %v3237_v24, %v511_v7 }
 0x1c6   : > { %v541_v14 = vadd.f32 %v3238_v30, %v526_v13 }
 0x1c8   : > { %v597_v17 = vmul.f32 %v588_v15, %v541_v14 }
 0x1ca   : > { %v601_v18 = vpack.c.bf16 %v597_v17, %v596_v16 }
 0x1cc   : > { %3430 = vmatmul.mubr.bf16.gmra.mrb[4].mxu0 %v601_v18 }
 0x1cd   : > { %3465 = vmatprep.mubr.msk.bf16.mxu0 %vm4024_vm1, %v4023_v19 }
 0x252   : > { %v3427_v0 = vpop.f32.mrb[0].mxu0 }
 0x253   : > { %v716_v20 = vadd.f32 %v3427_v0, %v3239_v44  ;;  %v707_v23 = vpop.f32.mrb[1].mxu0  ;;  %v4380_v0 = vld [vmem:[%s4947_s9 + $0x30] sm:$0xff] }
 0x254   : > { %v708_v24 = vadd.f32 %v3239_v44, %v707_v23  ;;  %v3428_v25 = vpop.f32.mrb[2].mxu0 }
 0x255   : > { %v719_v26 = vadd.f32 %v3428_v25, %v3239_v44  ;;  %v710_v27 = vpop.f32.mrb[3].mxu0  ;;  %v748_v29 = vmul.f32 0.35355338, %v716_v20  ;;  %v4386_v25 = vld [vmem:[%s4947_s9 + $0x38] sm:$0xff] }
 0x256   : > { %v711_v28 = vadd.f32 %v3239_v44, %v710_v27  ;;  %v746_v34 = vmul.f32 0.35355338, %v708_v24 }
 0x257   : > { %v749_v30 = vmul.f32 0.35355338, %v719_v26  ;;  %v4303_v33 = vpack.c.bf16 %v719_v26, %v716_v20 }
 0x258   : > { %v747_v35 = vmul.f32 0.35355338, %v711_v28  ;;  %v4305_v36 = vpack.c.bf16 %v711_v28, %v708_v24 }
 0x259   : > { %v4307_v37 = vpack.c.bf16 %v749_v30, %v748_v29  ;;  %816 = vrot.lane.b32.xlu0 %v4303_v33, %s4025_s30 }
 0x25a   : > { %v4310_v38 = vpack.c.bf16 %v747_v35, %v746_v34  ;;  %765 = vrot.lane.b32.xlu1 %v4305_v36, %s4025_s30 }
 0x29f   : > { %v3431_v41 = vpop.f32.mrb[4].mxu0 }
 0x2a0   : > { %v732_v42 = vadd.f32 %v3431_v41, %v3239_v44  ;;  %v723_v43 = vpop.f32.mrb[5].mxu0 }
 0x2a1   : > { %v724_v21 = vadd.f32 %v3239_v44, %v723_v43  ;;  %v3432_v45 = vpop.f32.mrb[6].mxu0 }
 0x2a2   : > { %v735_v46 = vadd.f32 %v3432_v45, %v3239_v44  ;;  %v726_v47 = vpop.f32.mrb[7].mxu0  ;;  %v752_v49 = vmul.f32 0.35355338, %v732_v42 }
 0x2a3   : > { %v727_v48 = vadd.f32 %v3239_v44, %v726_v47  ;;  %v750_v52 = vmul.f32 0.35355338, %v724_v21 }
 0x2a4   : > { %v753_v50 = vmul.f32 0.35355338, %v735_v46  ;;  %v4313_v51 = vpack.c.bf16 %v735_v46, %v732_v42 }
 0x2a5   : > { %v751_v31 = vmul.f32 0.35355338, %v727_v48  ;;  %v4315_v53 = vpack.c.bf16 %v727_v48, %v724_v21 }
 0x2a6   : > { %v4317_v54 = vpack.c.bf16 %v753_v50, %v752_v49  ;;  %916 = vrot.lane.b32.xlu0 %v4313_v51, %s4025_s30 }
 0x2a7   : > { %v4320_v22 = vpack.c.bf16 %v751_v31, %v750_v52  ;;  %866 = vrot.lane.b32.xlu1 %v4315_v53, %s4025_s30 }
 0x2cb   : > { %v817_v57 = vpop.permute.xlu0 %816 }
 0x2cc   : > { %v766_v55 = vpop.permute.xlu1 %765  ;;  %v822_v58 = vsel %vm767_vm2, %v817_v57, 0 }
 0x2cd   : > { %v772_v56 = vsel %vm767_vm2, %v766_v55, 0 }
 0x2ce   : > { %3434 = vmatpush3.bf16.xpose.msra.mxu1 %v772_v56 }
 0x2cf   : > { %3439 = vmatprep.subr.bf16.mxu1 %v4023_v19 }
 0x2d5   : > { %3436 = vmatmul.mubr.msk.bf16.vlgmr.msra.gmra.mrb[0].mxu1 %vm767_vm2, %v4310_v38 }
 0x2d6   : > { %3440 = vmatpush3.bf16.xpose.msra.mxu1 %v822_v58  ;;  %3441 = vmatprep.mubr.msk.bf16.mxu1 %vm4024_vm1, %v4023_v19 }
 0x2d7   : > { %3445 = vmatprep.subr.bf16.mxu1 %v4023_v19 }
 0x2dd   : > { %3442 = vmatmul.mubr.msk.bf16.vlgmr.msra.gmra.mrb[4].mxu1 %vm767_vm2, %v4307_v37 }
 0x2de   : > { %3447 = vmatprep.mubr.msk.bf16.mxu1 %vm4024_vm1, %v4023_v19 }
 0x318   : > { %v917_v32 = vpop.permute.xlu0 %916 }
 0x319   : > { %v867_v59 = vpop.permute.xlu1 %866  ;;  %v922_v61 = vsel %vm767_vm2, %v917_v32, 0 }
 0x31a   : > { %v872_v60 = vsel %vm767_vm2, %v867_v59, 0 }
 0x31b   : > { %3446 = vmatpush3.bf16.xpose.msra.mxu1 %v872_v60 }
 0x31c   : > { %3451 = vmatprep.subr.bf16.mxu1 %v4023_v19 }
 0x322   : > { %3448 = vmatmul.mubr.msk.bf16.vlgmr.msra.gmra.mrb[8].mxu1 %vm767_vm2, %v4320_v22 }
 0x323   : > { %3452 = vmatpush3.bf16.xpose.msra.mxu1 %v922_v61  ;;  %3453 = vmatprep.mubr.msk.bf16.mxu1 %vm4024_vm1, %v4023_v19 }
 0x324   : > { %3457 = vmatprep.subr.bf16.mxu1 %v4023_v19 }
 0x32a   : > { %3454 = vmatmul.mubr.msk.bf16.vlgmr.msra.gmra.mrb[12].mxu1 %vm767_vm2, %v4317_v54 }
 0x32b   : > { %3459 = vmatprep.mubr.msk.bf16.mxu1 %vm4024_vm1, %v4023_v19 }
 0x3a8   : > { %v4347_v62 = vpop.f32.mrb[0].mxu1 }
 0x3a9   : > { %v3437_v39 = vpop.f32.mrb[1].mxu1  ;;  %v809_v61 = vadd.f32 %v4347_v62, %v4354_v2  ;;  %v4428_v62 = vld [vmem:[%s4947_s9 + $0x28] sm:$0xff] }
 0x3aa   : > { %v4349_v63 = vpop.f32.mrb[2].mxu1  ;;  %v4414_v39 = vld [vmem:[%s4947_s9] sm:$0xff] }
 0x3ab   : > { %v3438_v1 = vpop.f32.mrb[3].mxu1 }
 0x3ac   : > { %v812_v1 = vadd.f32 %v4349_v63, %v4365_v40  ;;  %v4435_v63 = vld [vmem:[%s4947_s9 + $0x20] sm:$0xff] }
 0x3b0   : > { %v858_v3 = vpop.f32.mrb[4].mxu1 }
 0x3b1   : > { %v859_v5 = vadd.f32 %v858_v3, %v4354_v2  ;;  %v3443_v6 = vpop.f32.mrb[5].mxu1  ;;  %v4421_v3 = vld [vmem:[%s4947_s9 + $0x8] sm:$0xff] }
 0x3b2   : > { %v861_v8 = vpop.f32.mrb[6].mxu1  ;;  %v965_v6 = vadd.f32 %v809_v61, %v4414_v39 }
 0x3b3   : > { %v862_v11 = vadd.f32 %v861_v8, %v4365_v40  ;;  %v3444_v12 = vpop.f32.mrb[7].mxu1  ;;  %v967_v7 = vadd.f32 %v859_v5, %v4359_v4 }
 0x3b4   : > { %v974_v12 = vsel %vm973_vm3, %v965_v6, -inf }
 0x3b5   : > { %v980_v13 = vsel %vm973_vm3, %v967_v7, -inf  ;;  %v968_v10 = vadd.f32 %v862_v11, %v4370_v9  ;;  %v966_v11 = vadd.f32 %v812_v1, %v4421_v3 }
 0x3b6   : > { %981 = vmax.xlane.f32.xlu1 %v980_v13 }
 0x3b7   : > { %v983_v14 = vsel %vm973_vm3, %v968_v10, -inf }
 0x3b8   : > { %984 = vmax.xlane.f32.xlu0 %v983_v14 }
 0x3f5   : > { %v908_v15 = vpop.f32.mrb[8].mxu1 }
 0x3f6   : > { %v3449_v16 = vpop.f32.mrb[9].mxu1  ;;  %v909_v8 = vadd.f32 %v908_v15, %v4354_v2 }
 0x3f7   : > { %v911_v17 = vpop.f32.mrb[10].mxu1 }
 0x3f8   : > { %v3450_v18 = vpop.f32.mrb[11].mxu1  ;;  %v912_v5 = vadd.f32 %v911_v17, %v4365_v40  ;;  %v969_v13 = vadd.f32 %v909_v8, %v4435_v63 }
 0x3fd   : > { %v958_v44 = vpop.f32.mrb[12].mxu1 }
 0x3fe   : > { %v959_v20 = vadd.f32 %v958_v44, %v4354_v2  ;;  %v3455_v23 = vpop.f32.mrb[13].mxu1  ;;  %v986_v2 = vsel %vm973_vm3, %v969_v13, -inf }
 0x3ff   : > { %v961_v24 = vpop.f32.mrb[14].mxu1 }
 0x400   : > { %v962_v26 = vadd.f32 %v961_v24, %v4365_v40  ;;  %v3456_v27 = vpop.f32.mrb[15].mxu1  ;;  %v971_v28 = vadd.f32 %v959_v20, %v4380_v0  ;;  %v970_v40 = vadd.f32 %v912_v5, %v4428_v62 }
 0x402   : > { %v992_v29 = vsel %vm973_vm3, %v971_v28, -inf  ;;  %v972_v30 = vadd.f32 %v962_v26, %v4386_v25 }
 0x403   : > { %993 = vmax.xlane.f32.xlu0 %v992_v29 }
 0x404   : > { %v995_v34 = vsel %vm973_vm3, %v972_v30, -inf }
 0x405   : > { %996 = vmax.xlane.f32.xlu1 %v995_v34 }
 0x443   : > { %v982_v35 = vpop.xlane.xlu1 %981 }
 0x444   : > { %v1000_v41 = vsub.f32 %v967_v7, %v982_v35  ;;  %v977_v7 = vsel %vm973_vm3, %v966_v11, -inf }
 0x445   : > { %v985_v42 = vpop.xlane.xlu0 %984 }
 0x446   : > { %v1010_v43 = vmul.f32 1.442695, %v1000_v41  ;;  %v1001_v21 = vsub.f32 %v968_v10, %v985_v42  ;;  %v989_v10 = vsel %vm973_vm3, %v970_v40, -inf }
 0x448   : > { %3787 = vpow2.f32 %v1010_v43  ;;  %v1012_v45 = vmul.f32 1.442695, %v1001_v21 }
 0x44a   : > { %3789 = vpow2.f32 %v1012_v45 }
 0x452   : > { %v3788_v46 = vpop.eup %3787 }
 0x453   : > { %v1028_v47 = vsel %vm973_vm3, %v3788_v46, 0.0 }
 0x454   : > { %v3790_v48 = vpop.eup %3789  ;;  %1029 = vadd.xlane.f32.xlu0 %v1028_v47 }
 0x455   : > { %v1031_v49 = vsel %vm973_vm3, %v3790_v48, 0.0 }
 0x456   : > { %1032 = vadd.xlane.f32.xlu1 %v1031_v49 }
 0x467   : > { %1207 = vrot.lane.b32.xlu1 %v4313_v51, %s4026_s18 }
 0x490   : > { %v994_v50 = vpop.xlane.xlu0 %993 }
 0x491   : > { %v1004_v52 = vsub.f32 %v971_v28, %v994_v50 }
 0x492   : > { %v997_v31 = vpop.xlane.xlu1 %996 }
 0x493   : > { %v1018_v55 = vmul.f32 1.442695, %v1004_v52  ;;  %v1005_v56 = vsub.f32 %v972_v30, %v997_v31 }
 0x495   : > { %3791 = vpow2.f32 %v1018_v55  ;;  %v1020_v57 = vmul.f32 1.442695, %v1005_v56 }
 0x497   : > { %3793 = vpow2.f32 %v1020_v57 }
 0x49f   : > { %v3792_v58 = vpop.eup %3791 }
 0x4a0   : > { %v1040_v59 = vsel %vm973_vm3, %v3792_v58, 0.0 }
 0x4a1   : > { %v3794_v60 = vpop.eup %3793  ;;  %1041 = vadd.xlane.f32.xlu0 %v1040_v59 }
 0x4a2   : > { %v1043_v32 = vsel %vm973_vm3, %v3794_v60, 0.0 }
 0x4a3   : > { %1044 = vadd.xlane.f32.xlu1 %v1043_v32 }
 0x4b4   : > { %1317 = vrot.lane.b32.xlu1 %v4303_v33, %s4027_s20 }
 0x4b7   : > { %1113 = vrot.lane.b32.xlu0 %v4303_v33, %s4026_s18 }
 0x4b8   : > { %1421 = vrot.lane.b32.xlu1 %v4313_v51, %s4027_s20 }
 0x4bb   : > { %1315 = vrot.lane.b32.xlu0 %v4307_v37, %s4028_s27 }
 0x4bf   : > { %1419 = vrot.lane.b32.xlu0 %v4317_v54, %s4028_s27 }
 0x4dc   : > { %975 = vmax.xlane.f32.xlu1 %v974_v12 }
 0x4de   : > { %978 = vmax.xlane.f32.xlu0 %v977_v7 }
 0x4e0   : > { %990 = vmax.xlane.f32.xlu1 %v989_v10 }
 0x4e1   : > { %v1030_v15 = vpop.xlane.xlu0 %1029 }
 0x4e2   : > { %987 = vmax.xlane.f32.xlu0 %v986_v2 }
 0x4e3   : > { %v1033_v14 = vpop.xlane.xlu1 %1032 }
 0x4e4   : > { %3795 = vrcp.f32 %v1033_v14 }
 0x4e5   : > { %3797 = vrcp.f32 %v1030_v15 }
 0x4e7   : > { %v1208_v16 = vpop.permute.xlu1 %1207 }
 0x4ee   : > { %v3796_v17 = vpop.eup %3795 }
 0x4ef   : > { %v3798_v44 = vpop.eup %3797  ;;  %v1057_v20 = vmul.f32 %v3796_v17, %v3790_v48 }
 0x4f0   : > { %v1056_v24 = vmul.f32 %v3798_v44, %v3788_v46 }
 0x4f2   : > { %v1063_v27 = vpack.c.bf16 %v1057_v20, %v1056_v24 }
 0x52e   : > { %v1042_v18 = vpop.xlane.xlu0 %1041 }
 0x52f   : > { %3799 = vrcp.f32 %v1042_v18 }
 0x530   : > { %v1045_v23 = vpop.xlane.xlu1 %1044 }
 0x531   : > { %3801 = vrcp.f32 %v1045_v23 }
 0x532   : > { %v1114_v26 = vpop.permute.xlu0 %1113 }
 0x533   : > { %3464 = vmatpush3.bf16.msra.mxu0 %v1114_v26 }
 0x534   : > { %3475 = vmatprep.subr.bf16.mxu0 %v4023_v19  ;;  %v1318_v35 = vpop.permute.xlu1 %1317 }
 0x535   : > { %v1323_v42 = vsel %vm767_vm2, %v1318_v35, 0 }
 0x536   : > { %3466 = vmatmul.mubr.msk.bf16.vlgmr.msra.gmra.mrb[8].mxu0 %vm973_vm3, %v1063_v27  ;;  %v1316_v21 = vpop.permute.xlu0 %1315 }
 0x537   : > { %3476 = vmatpush3.bf16.msra.mxu0 %v1208_v16  ;;  %3477 = vmatprep.mubr.msk.bf16.mxu0 %vm4024_vm1, %v4023_v19 }
 0x538   : > { %3487 = vmatprep.subr.bf16.mxu0 %v4023_v19  ;;  %v1422_v43 = vpop.permute.xlu1 %1421 }
 0x539   : > { %v3800_v28 = vpop.eup %3799  ;;  %v1427_v45 = vsel %vm767_vm2, %v1422_v43, 0  ;;  %v4494_v43 = vld [vmem:[%s4946_s8 + $0x10] sm:$0xff] }
 0x53a   : > { %v1060_v30 = vmul.f32 %v3800_v28, %v3792_v58  ;;  %v1420_v46 = vpop.permute.xlu0 %1419 }
 0x53b   : > { %v3802_v29 = vpop.eup %3801 }
 0x53c   : > { %v1061_v34 = vmul.f32 %v3802_v29, %v3794_v60 }
 0x53e   : > { %v1065_v41 = vpack.c.bf16 %v1061_v34, %v1060_v30 }
 0x540   : > { %3478 = vmatmul.mubr.msk.bf16.vlgmr.msra.gmra.mrb[12].mxu0 %vm973_vm3, %v1065_v41 }
 0x541   : > { %3488 = vmatpush3.bf16.xpose.msra.mxu0 %v1323_v42  ;;  %3489 = vmatprep.mubr.msk.bf16.mxu0 %vm4024_vm1, %v4023_v19 }
 0x542   : > { %3499 = vmatprep.subr.bf16.mxu0 %v4023_v19 }
 0x548   : > { %3490 = vmatmul.mubr.msk.bf16.vlgmr.msra.gmra.mrb[16].mxu0 %vm767_vm2, %v1316_v21 }
 0x549   : > { %3500 = vmatpush3.bf16.xpose.msra.mxu0 %v1427_v45  ;;  %3501 = vmatprep.mubr.msk.bf16.mxu0 %vm4024_vm1, %v4023_v19 }
 0x54a   : > { %3511 = vmatprep.subr.bf16.mxu0 %v4023_v19 }
 0x550   : > { %3502 = vmatmul.mubr.msk.bf16.vlgmr.msra.gmra.mrb[20].mxu0 %vm767_vm2, %v1420_v46 }
 0x551   : > { %3513 = vmatprep.mubr.msk.bf16.mxu0 %vm4024_vm1, %v4023_v19 }
 0x569   : > { %v976_v47 = vpop.xlane.xlu1 %975 }
 0x56a   : > { %v998_v48 = vsub.f32 %v965_v6, %v976_v47  ;;  %v4501_v47 = vld [vmem:[%s4946_s8 + $0x18] sm:$0xff] }
 0x56b   : > { %v979_v49 = vpop.xlane.xlu0 %978 }
 0x56c   : > { %v1006_v50 = vmul.f32 1.442695, %v998_v48  ;;  %v999_v52 = vsub.f32 %v966_v11, %v979_v49 }
 0x56d   : > { %v991_v31 = vpop.xlane.xlu1 %990 }
 0x56e   : > { %3803 = vpow2.f32 %v1006_v50  ;;  %v1008_v55 = vmul.f32 1.442695, %v999_v52  ;;  %v1003_v56 = vsub.f32 %v970_v40, %v991_v31 }
 0x56f   : > { %v988_v57 = vpop.xlane.xlu0 %987 }
 0x570   : > { %3805 = vpow2.f32 %v1008_v55  ;;  %v1016_v58 = vmul.f32 1.442695, %v1003_v56  ;;  %v1002_v59 = vsub.f32 %v969_v13, %v988_v57 }
 0x572   : > { %3807 = vpow2.f32 %v1016_v58  ;;  %v1014_v60 = vmul.f32 1.442695, %v1002_v59 }
 0x574   : > { %3809 = vpow2.f32 %v1014_v60 }
 0x578   : > { %v3804_v32 = vpop.eup %3803 }
 0x579   : > { %v1022_v61 = vsel %vm973_vm3, %v3804_v32, 0.0 }
 0x57a   : > { %v3806_v1 = vpop.eup %3805  ;;  %1023 = vadd.xlane.f32.xlu0 %v1022_v61 }
 0x57b   : > { %v1025_v5 = vsel %vm973_vm3, %v3806_v1, 0.0 }
 0x57c   : > { %v3808_v6 = vpop.eup %3807  ;;  %1026 = vadd.xlane.f32.xlu1 %v1025_v5 }
 0x57d   : > { %v1037_v12 = vsel %vm973_vm3, %v3808_v6, 0.0 }
 0x57e   : > { %v3810_v8 = vpop.eup %3809 }
 0x57f   : > { %v1034_v11 = vsel %vm973_vm3, %v3810_v8, 0.0 }
 0x580   : > { %1035 = vadd.xlane.f32.xlu0 %v1034_v11  ;;  %1038 = vadd.xlane.f32.xlu1 %v1037_v12 }
 0x591   : > { %1160 = vrot.lane.b32.xlu1 %v4315_v53, %s4026_s18 }
 0x595   : > { %1265 = vrot.lane.b32.xlu1 %v4305_v36, %s4027_s20 }
 0x596   : > { %1066 = vrot.lane.b32.xlu0 %v4305_v36, %s4026_s18  ;;  %s4032_s18 = smov 48  }
 0x599   : > { %1369 = vrot.lane.b32.xlu1 %v4315_v53, %s4027_s20  ;;  %s4033_s20 = smov 72  }
 0x59a   : > { %1263 = vrot.lane.b32.xlu0 %v4310_v38, %s4028_s27 }
 0x59e   : > { %1367 = vrot.lane.b32.xlu0 %v4320_v22, %s4028_s27  ;;  %s4034_s27 = smov 104  }
 0x607   : > { %v1024_v40 = vpop.xlane.xlu0 %1023 }
 0x608   : > { %3811 = vrcp.f32 %v1024_v40 }
 0x609   : > { %v4477_v7 = vpop.f32.mrb[8].mxu0  ;;  %v1027_v13 = vpop.xlane.xlu1 %1026 }
 0x60a   : > { %3813 = vrcp.f32 %v1027_v13  ;;  %v3467_v10 = vpop.f32.mrb[9].mxu0 }
 0x60b   : > { %v4479_v2 = vpop.f32.mrb[10].mxu0 }
 0x60c   : > { %v1255_v14 = vpack.c.bf16 %v4479_v2, %v4477_v7  ;;  %v3468_v15 = vpop.f32.mrb[11].mxu0 }
 0x60d   : > { %v1036_v16 = vpop.xlane.xlu0 %1035  ;;  %v1039_v17 = vpop.xlane.xlu1 %1038 }
 0x60e   : > { %3815 = vrcp.f32 %v1036_v16 }
 0x60f   : > { %3817 = vrcp.f32 %v1039_v17 }
 0x611   : > { %v1067_v18 = vpop.permute.xlu0 %1066  ;;  %v1161_v42 = vpop.permute.xlu1 %1160 }
 0x612   : > { %v3812_v44 = vpop.eup %3811  ;;  %3458 = vmatpush3.bf16.msra.mxu1 %v1067_v18 }
 0x613   : > { %v4483_v20 = vpop.f32.mrb[12].mxu0  ;;  %3469 = vmatprep.subr.bf16.mxu1 %v4023_v19  ;;  %v1054_v26 = vmul.f32 %v3812_v44, %v3804_v32 }
 0x614   : > { %v3814_v23 = vpop.eup %3813  ;;  %v3479_v24 = vpop.f32.mrb[13].mxu0 }
 0x615   : > { %v1055_v27 = vmul.f32 %v3814_v23, %v3806_v1  ;;  %v4486_v28 = vpop.f32.mrb[14].mxu0  ;;  %v1266_v56 = vpop.permute.xlu1 %1265 }
 0x616   : > { %v1257_v29 = vpack.c.bf16 %v4486_v28, %v4483_v20  ;;  %v3480_v30 = vpop.f32.mrb[15].mxu0  ;;  %v1271_v60 = vsel %vm767_vm2, %v1266_v56, 0  ;;  %v1264_v15 = vpop.permute.xlu0 %1263 }
 0x617   : > { %v1062_v34 = vpack.c.bf16 %v1055_v27, %v1054_v26 }
 0x618   : > { %v3816_v35 = vpop.eup %3815 }
 0x619   : > { %v3818_v41 = vpop.eup %3817  ;;  %3460 = vmatmul.mubr.msk.bf16.vlgmr.msra.gmra.mrb[16].mxu1 %vm973_vm3, %v1062_v34  ;;  %v1058_v21 = vmul.f32 %v3816_v35, %v3810_v8  ;;  %v1370_v40 = vpop.permute.xlu1 %1369 }
 0x61a   : > { %3470 = vmatpush3.bf16.msra.mxu1 %v1161_v42  ;;  %3471 = vmatprep.mubr.msk.bf16.mxu1 %vm4024_vm1, %v4023_v19  ;;  %v1059_v45 = vmul.f32 %v3818_v41, %v3808_v6  ;;  %v1375_v16 = vsel %vm767_vm2, %v1370_v40, 0  ;;  %v1368_v18 = vpop.permute.xlu0 %1367 }
 0x61b   : > { %v1359_v46 = vpop.f32.mrb[16].mxu0  ;;  %3481 = vmatprep.subr.bf16.mxu1 %v4023_v19 }
 0x61c   : > { %v1360_v48 = vadd.f32 %v4494_v43, %v1359_v46  ;;  %v3491_v49 = vpop.f32.mrb[17].mxu0  ;;  %v1064_v57 = vpack.c.bf16 %v1059_v45, %v1058_v21 }
 0x61d   : > { %v1362_v50 = vpop.f32.mrb[18].mxu0 }
 0x61e   : > { %v1363_v52 = vadd.f32 %v4501_v47, %v1362_v50  ;;  %v3492_v31 = vpop.f32.mrb[19].mxu0  ;;  %v1472_v55 = vadd.f32 %v1360_v48, %v4359_v4 }
 0x620   : > { %v1484_v58 = vsel %vm973_vm3, %v1472_v55, -inf  ;;  %v1473_v59 = vadd.f32 %v1363_v52, %v4370_v9 }
 0x621   : > { %1485 = vmax.xlane.f32.xlu1 %v1484_v58  ;;  %3472 = vmatmul.mubr.msk.bf16.vlgmr.msra.gmra.mrb[20].mxu1 %vm973_vm3, %v1064_v57 }
 0x622   : > { %v1487_v32 = vsel %vm973_vm3, %v1473_v59, -inf  ;;  %3483 = vmatprep.mubr.msk.bf16.mxu1 %vm4024_vm1, %v4023_v19 }
 0x623   : > { %3482 = vmatpush3.bf16.xpose.msra.mxu1 %v1271_v60  ;;  %v1463_v61 = vpop.f32.mrb[20].mxu0  ;;  %1488 = vmax.xlane.f32.xlu0 %v1487_v32 }
 0x624   : > { %v1464_v1 = vadd.f32 %v4494_v43, %v1463_v61  ;;  %v3503_v5 = vpop.f32.mrb[21].mxu0  ;;  %3493 = vmatprep.subr.bf16.mxu1 %v4023_v19 }
 0x625   : > { %v1466_v6 = vpop.f32.mrb[22].mxu0 }
 0x626   : > { %v1467_v8 = vadd.f32 %v4501_v47, %v1466_v6  ;;  %v3504_v11 = vpop.f32.mrb[23].mxu0  ;;  %v1476_v12 = vadd.f32 %v1464_v1, %v4380_v0 }
 0x628   : > { %v1496_v13 = vsel %vm973_vm3, %v1476_v12, -inf  ;;  %v1477_v10 = vadd.f32 %v1467_v8, %v4386_v25 }
 0x629   : > { %1497 = vmax.xlane.f32.xlu0 %v1496_v13 }
 0x62a   : > { %3484 = vmatmul.mubr.msk.bf16.vlgmr.msra.gmra.mrb[24].mxu1 %vm767_vm2, %v1264_v15  ;;  %v1499_v17 = vsel %vm973_vm3, %v1477_v10, -inf }
 0x62b   : > { %3494 = vmatpush3.bf16.xpose.msra.mxu1 %v1375_v16  ;;  %1500 = vmax.xlane.f32.xlu1 %v1499_v17 }
 0x62c   : > { %3495 = vmatprep.mubr.msk.bf16.mxu1 %vm4024_vm1, %v4023_v19  ;;  %3505 = vmatprep.subr.bf16.mxu1 %v4023_v19 }
 0x632   : > { %3496 = vmatmul.mubr.msk.bf16.vlgmr.msra.gmra.mrb[28].mxu1 %vm767_vm2, %v1368_v18 }
 0x633   : > { %3507 = vmatprep.mubr.msk.bf16.mxu1 %vm4024_vm1, %v4023_v19 }
 0x6ae   : > { %v1486_v44 = vpop.xlane.xlu1 %1485 }
 0x6af   : > { %v1504_v23 = vsub.f32 %v1472_v55, %v1486_v44 }
 0x6b0   : > { %v1489_v24 = vpop.xlane.xlu0 %1488 }
 0x6b1   : > { %v1514_v26 = vmul.f32 1.442695, %v1504_v23  ;;  %v1505_v27 = vsub.f32 %v1473_v59, %v1489_v24 }
 0x6b3   : > { %3819 = vpow2.f32 %v1514_v26  ;;  %v1516_v30 = vmul.f32 1.442695, %v1505_v27 }
 0x6b5   : > { %3821 = vpow2.f32 %v1516_v30 }
 0x6b6   : > { %v1498_v34 = vpop.xlane.xlu0 %1497 }
 0x6b7   : > { %v1508_v35 = vsub.f32 %v1476_v12, %v1498_v34 }
 0x6b8   : > { %v1501_v50 = vpop.xlane.xlu1 %1500 }
 0x6b9   : > { %v1522_v41 = vmul.f32 1.442695, %v1508_v35  ;;  %v1509_v52 = vsub.f32 %v1477_v10, %v1501_v50 }
 0x6bb   : > { %3823 = vpow2.f32 %v1522_v41  ;;  %v1524_v31 = vmul.f32 1.442695, %v1509_v52 }
 0x6bd   : > { %v4529_v42 = vpop.eup %3819  ;;  %3825 = vpow2.f32 %v1524_v31 }
 0x6be   : > { %v1532_v21 = vsel %vm973_vm3, %v4529_v42, 0.0 }
 0x6bf   : > { %v4533_v45 = vpop.eup %3821  ;;  %1533 = vadd.xlane.f32.xlu0 %v1532_v21 }
 0x6c0   : > { %v1535_v46 = vsel %vm973_vm3, %v4533_v45, 0.0 }
 0x6c1   : > { %1536 = vadd.xlane.f32.xlu1 %v1535_v46 }
 0x6c5   : > { %v4537_v48 = vpop.eup %3823 }
 0x6c6   : > { %v1544_v49 = vsel %vm973_vm3, %v4537_v48, 0.0 }
 0x6c7   : > { %1545 = vadd.xlane.f32.xlu0 %v1544_v49  ;;  %v4555_v60 = vpop.eup %3825 }
 0x6c8   : > { %v1547_v1 = vsel %vm973_vm3, %v4555_v60, 0.0 }
 0x6d2   : > { %1711 = vrot.lane.b32.xlu1 %v4313_v51, %s4029_s21 }
 0x6dd   : > { %1617 = vrot.lane.b32.xlu0 %v4303_v33, %s4029_s21 }
 0x6e1   : > { %1927 = vrot.lane.b32.xlu0 %v4310_v38, %s4030_s26 }
 0x6e5   : > { %1978 = vrot.lane.b32.xlu0 %v4307_v37, %s4030_s26 }
 0x6e9   : > { %2029 = vrot.lane.b32.xlu0 %v4320_v22, %s4030_s26 }
 0x6ec   : > { %v4548_v55 = vpop.f32.mrb[16].mxu1 }
 0x6ed   : > { %2080 = vrot.lane.b32.xlu0 %v4317_v54, %s4030_s26  ;;  %v3461_v56 = vpop.f32.mrb[17].mxu1 }
 0x6ee   : > { %v4551_v57 = vpop.f32.mrb[18].mxu1 }
 0x6ef   : > { %v1254_v58 = vpack.c.bf16 %v4551_v57, %v4548_v55  ;;  %v3462_v59 = vpop.f32.mrb[19].mxu1 }
 0x6f4   : > { %v4557_v32 = vpop.f32.mrb[20].mxu1 }
 0x6f5   : > { %v3473_v61 = vpop.f32.mrb[21].mxu1 }
 0x6f6   : > { %1548 = vadd.xlane.f32.xlu1 %v1547_v1  ;;  %v4561_v5 = vpop.f32.mrb[22].mxu1 }
 0x6f7   : > { %v1256_v6 = vpack.c.bf16 %v4561_v5, %v4557_v32  ;;  %v3474_v8 = vpop.f32.mrb[23].mxu1 }
 0x6fd   : > { %v1307_v11 = vpop.f32.mrb[24].mxu1 }
 0x6fe   : > { %v3485_v12 = vpop.f32.mrb[25].mxu1  ;;  %v1308_v30 = vadd.f32 %v4494_v43, %v1307_v11 }
 0x6ff   : > { %v1310_v40 = vpop.f32.mrb[26].mxu1 }
 0x700   : > { %v3486_v13 = vpop.f32.mrb[27].mxu1  ;;  %v1311_v10 = vadd.f32 %v4501_v47, %v1310_v40  ;;  %v4581_v35 = vadd.f32 %v1308_v30, %v4414_v39 }
 0x702   : > { %v1471_v44 = vadd.f32 %v1311_v10, %v4421_v3  ;;  %v1478_v41 = vsel %vm973_vm3, %v4581_v35, -inf }
 0x704   : > { %v1481_v24 = vsel %vm973_vm3, %v1471_v44, -inf }
 0x705   : > { %v1411_v15 = vpop.f32.mrb[28].mxu1 }
 0x706   : > { %v3497_v16 = vpop.f32.mrb[29].mxu1  ;;  %v1412_v17 = vadd.f32 %v4494_v43, %v1411_v15 }
 0x707   : > { %v1414_v18 = vpop.f32.mrb[30].mxu1  ;;  %1929 = vrot.lane.b32.xlu1 %v4305_v36, %s4031_s11 }
 0x708   : > { %v3498_v23 = vpop.f32.mrb[31].mxu1  ;;  %v4572_v26 = vadd.f32 %v1412_v17, %v4435_v63  ;;  %v1415_v34 = vadd.f32 %v4501_v47, %v1414_v18 }
 0x70a   : > { %v1490_v27 = vsel %vm973_vm3, %v4572_v26, -inf  ;;  %v4586_v21 = vadd.f32 %v1415_v34, %v4428_v62 }
 0x70b   : > { %1980 = vrot.lane.b32.xlu1 %v4303_v33, %s4031_s11 }
 0x70c   : > { %1482 = vmax.xlane.f32.xlu0 %v1481_v24  ;;  %v1493_v46 = vsel %vm973_vm3, %v4586_v21, -inf }
 0x70f   : > { %2031 = vrot.lane.b32.xlu1 %v4315_v53, %s4031_s11 }
 0x710   : > { %1491 = vmax.xlane.f32.xlu0 %v1490_v27 }
 0x713   : > { %2082 = vrot.lane.b32.xlu1 %v4313_v51, %s4031_s11 }
 0x737   : > { %1479 = vmax.xlane.f32.xlu1 %v1478_v41 }
 0x73b   : > { %1494 = vmax.xlane.f32.xlu1 %v1493_v46 }
 0x74c   : > { %v1534_v49 = vpop.xlane.xlu0 %1533 }
 0x74d   : > { %3827 = vrcp.f32 %v1534_v49 }
 0x74e   : > { %v1537_v50 = vpop.xlane.xlu1 %1536 }
 0x74f   : > { %3829 = vrcp.f32 %v1537_v50 }
 0x752   : > { %v1712_v1 = vpop.permute.xlu1 %1711 }
 0x754   : > { %v1546_v43 = vpop.xlane.xlu0 %1545 }
 0x755   : > { %3831 = vrcp.f32 %v1546_v43 }
 0x757   : > { %v3828_v47 = vpop.eup %3827 }
 0x758   : > { %v1618_v52 = vpop.permute.xlu0 %1617  ;;  %v1560_v56 = vmul.f32 %v3828_v47, %v4529_v42 }
 0x759   : > { %v3830_v31 = vpop.eup %3829  ;;  %3512 = vmatpush3.bf16.msra.mxu0 %v1618_v52 }
 0x75a   : > { %v1561_v59 = vmul.f32 %v3830_v31, %v4533_v45  ;;  %3523 = vmatprep.subr.bf16.mxu0 %v4023_v19 }
 0x75c   : > { %v1567_v61 = vpack.c.bf16 %v1561_v59, %v1560_v56  ;;  %v1928_v8 = vpop.permute.xlu0 %1927 }
 0x75e   : > { %3514 = vmatmul.mubr.msk.bf16.vlgmr.msra.gmra.mrb[24].mxu0 %vm973_vm3, %v1567_v61 }
 0x75f   : > { %3524 = vmatpush3.bf16.msra.mxu0 %v1712_v1  ;;  %3525 = vmatprep.mubr.msk.bf16.mxu0 %vm4024_vm1, %v4023_v19  ;;  %v3832_v42 = vpop.eup %3831 }
 0x760   : > { %3549 = vmatprep.subr.bf16.mxu0 %v4023_v19  ;;  %v1979_v12 = vpop.permute.xlu0 %1978  ;;  %v1564_v45 = vmul.f32 %v3832_v42, %v4537_v48 }
 0x764   : > { %v2030_v13 = vpop.permute.xlu0 %2029 }
 0x768   : > { %v2081_v18 = vpop.permute.xlu0 %2080 }
 0x783   : > { %v1549_v11 = vpop.xlane.xlu1 %1548 }
 0x784   : > { %3833 = vrcp.f32 %v1549_v11 }
 0x787   : > { %v1930_v15 = vpop.permute.xlu1 %1929 }
 0x788   : > { %v1935_v17 = vsel %vm767_vm2, %v1930_v15, 0 }
 0x78b   : > { %v1981_v23 = vpop.permute.xlu1 %1980 }
 0x78c   : > { %v1986_v48 = vsel %vm767_vm2, %v1981_v23, 0 }
 0x78e   : > { %v3834_v40 = vpop.eup %3833 }
 0x78f   : > { %v1565_v10 = vmul.f32 %v3834_v40, %v4555_v60  ;;  %v2032_v30 = vpop.permute.xlu1 %2031 }
 0x790   : > { %v2037_v34 = vsel %vm767_vm2, %v2032_v30, 0 }
 0x791   : > { %v1569_v16 = vpack.c.bf16 %v1565_v10, %v1564_v45 }
 0x793   : > { %3526 = vmatmul.mubr.msk.bf16.vlgmr.msra.gmra.mrb[28].mxu0 %vm973_vm3, %v1569_v16  ;;  %v2083_v41 = vpop.permute.xlu1 %2082 }
 0x794   : > { %3550 = vmatpush3.bf16.xpose.msra.mxu0 %v1935_v17  ;;  %3551 = vmatprep.mubr.msk.bf16.mxu0 %vm4024_vm1, %v4023_v19  ;;  %v2088_v49 = vsel %vm767_vm2, %v2083_v41, 0  ;;  %v3274_v41 = vld [vmem:[%s4946_s8 + $0x20] sm:$0xff] }
 0x795   : > { %3555 = vmatprep.subr.bf16.mxu0 %v4023_v19 }
 0x799   : > { %v1483_v24 = vpop.xlane.xlu0 %1482 }
 0x79a   : > { %v1503_v27 = vsub.f32 %v1471_v44, %v1483_v24 }
 0x79b   : > { %3552 = vmatmul.mubr.msk.bf16.vlgmr.msra.gmra.mrb[32].mxu0 %vm767_vm2, %v1928_v8 }
 0x79c   : > { %v1512_v60 = vmul.f32 1.442695, %v1503_v27  ;;  %3556 = vmatpush3.bf16.xpose.msra.mxu0 %v1986_v48  ;;  %3557 = vmatprep.mubr.msk.bf16.mxu0 %vm4024_vm1, %v4023_v19 }
 0x79d   : > { %3561 = vmatprep.subr.bf16.mxu0 %v4023_v19  ;;  %v1492_v50 = vpop.xlane.xlu0 %1491 }
 0x79e   : > { %3835 = vpow2.f32 %v1512_v60  ;;  %v1506_v43 = vsub.f32 %v4572_v26, %v1492_v50 }
 0x7a0   : > { %v1518_v31 = vmul.f32 1.442695, %v1506_v43 }
 0x7a3   : > { %3558 = vmatmul.mubr.msk.bf16.vlgmr.msra.gmra.mrb[36].mxu0 %vm767_vm2, %v1979_v12 }
 0x7a4   : > { %3562 = vmatpush3.bf16.xpose.msra.mxu0 %v2037_v34  ;;  %3563 = vmatprep.mubr.msk.bf16.mxu0 %vm4024_vm1, %v4023_v19 }
 0x7a5   : > { %3567 = vmatprep.subr.bf16.mxu0 %v4023_v19 }
 0x7a8   : > { %v3836_v44 = vpop.eup %3835 }
 0x7a9   : > { %v1529_v46 = vsel %vm973_vm3, %v3836_v44, 0.0 }
 0x7aa   : > { %1530 = vadd.xlane.f32.xlu1 %v1529_v46 }
 0x7ab   : > { %3564 = vmatmul.mubr.msk.bf16.vlgmr.msra.gmra.mrb[40].mxu0 %vm767_vm2, %v2030_v13 }
 0x7ac   : > { %3568 = vmatpush3.bf16.xpose.msra.mxu0 %v2088_v49  ;;  %3569 = vmatprep.mubr.msk.bf16.mxu0 %vm4024_vm1, %v4023_v19 }
 0x7ad   : > { %3579 = vmatprep.subr.bf16.mxu0 %v4023_v19 }
 0x7b3   : > { %3570 = vmatmul.mubr.msk.bf16.vlgmr.msra.gmra.mrb[44].mxu0 %vm767_vm2, %v2081_v18 }
 0x7b4   : > { %3581 = vmatprep.mubr.msk.bf16.mxu0 %vm4024_vm1, %v4023_v19 }
 0x7c4   : > { %v1480_v47 = vpop.xlane.xlu1 %1479 }
 0x7c5   : > { %v1502_v52 = vsub.f32 %v4581_v35, %v1480_v47  ;;  %v3275_v47 = vld [vmem:[%s4946_s8 + $0x28] sm:$0xff] }
 0x7c7   : > { %v1510_v56 = vmul.f32 1.442695, %v1502_v52 }
 0x7c8   : > { %v1495_v59 = vpop.xlane.xlu1 %1494 }
 0x7c9   : > { %3837 = vpow2.f32 %v1510_v56  ;;  %v1507_v61 = vsub.f32 %v4586_v21, %v1495_v59 }
 0x7ca   : > { %3839 = vpow2.f32 %v1518_v31 }
 0x7cb   : > { %v1520_v1 = vmul.f32 1.442695, %v1507_v61 }
 0x7cd   : > { %3841 = vpow2.f32 %v1520_v1 }
 0x7d3   : > { %v3838_v8 = vpop.eup %3837 }
 0x7d4   : > { %v1526_v11 = vsel %vm973_vm3, %v3838_v8, 0.0  ;;  %v3840_v12 = vpop.eup %3839 }
 0x7d5   : > { %1527 = vadd.xlane.f32.xlu0 %v1526_v11  ;;  %v1538_v26 = vsel %vm973_vm3, %v3840_v12, 0.0 }
 0x7d7   : > { %v3842_v42 = vpop.eup %3841 }
 0x7d8   : > { %v1541_v40 = vsel %vm973_vm3, %v3842_v42, 0.0 }
 0x7d9   : > { %1539 = vadd.xlane.f32.xlu0 %v1538_v26  ;;  %1542 = vadd.xlane.f32.xlu1 %v1541_v40 }
 0x7ea   : > { %1664 = vrot.lane.b32.xlu1 %v4315_v53, %s4029_s21 }
 0x7ef   : > { %1570 = vrot.lane.b32.xlu0 %v4305_v36, %s4029_s21 }
 0x831   : > { %v4633_v35 = vpop.f32.mrb[24].mxu0 }
 0x832   : > { %v3515_v21 = vpop.f32.mrb[25].mxu0 }
 0x833   : > { %v4635_v45 = vpop.f32.mrb[26].mxu0 }
 0x834   : > { %v1759_v13 = vpack.c.bf16 %v4635_v45, %v4633_v35  ;;  %v3516_v10 = vpop.f32.mrb[27].mxu0 }
 0x837   : > { %v1531_v15 = vpop.xlane.xlu1 %1530 }
 0x838   : > { %3843 = vrcp.f32 %v1531_v15 }
 0x842   : > { %v3844_v34 = vpop.eup %3843 }
 0x843   : > { %v1559_v49 = vmul.f32 %v3844_v34, %v3836_v44 }
 0x862   : > { %v1528_v16 = vpop.xlane.xlu0 %1527 }
 0x863   : > { %3845 = vrcp.f32 %v1528_v16 }
 0x866   : > { %v4639_v17 = vpop.f32.mrb[28].mxu0  ;;  %v1540_v18 = vpop.xlane.xlu0 %1539 }
 0x867   : > { %3847 = vrcp.f32 %v1540_v18  ;;  %v1543_v23 = vpop.xlane.xlu1 %1542  ;;  %v3527_v24 = vpop.f32.mrb[29].mxu0 }
 0x868   : > { %3849 = vrcp.f32 %v1543_v23  ;;  %v4641_v27 = vpop.f32.mrb[30].mxu0 }
 0x869   : > { %v1761_v48 = vpack.c.bf16 %v4641_v27, %v4639_v17  ;;  %v3528_v60 = vpop.f32.mrb[31].mxu0 }
 0x86a   : > { %v1571_v30 = vpop.permute.xlu0 %1570 }
 0x86b   : > { %3506 = vmatpush3.bf16.msra.mxu1 %v1571_v30  ;;  %v1665_v21 = vpop.permute.xlu1 %1664 }
 0x86c   : > { %3517 = vmatprep.subr.bf16.mxu1 %v4023_v19 }
 0x86d   : > { %v3846_v46 = vpop.eup %3845 }
 0x86e   : > { %v1558_v50 = vmul.f32 %v3846_v46, %v3838_v8  ;;  %v1971_v43 = vpop.f32.mrb[32].mxu0 }
 0x86f   : > { %v1972_v52 = vadd.f32 %v3274_v41, %v1971_v43  ;;  %v3553_v31 = vpop.f32.mrb[33].mxu0 }
 0x870   : > { %v1974_v56 = vpop.f32.mrb[34].mxu0  ;;  %v1566_v59 = vpack.c.bf16 %v1559_v49, %v1558_v50 }
 0x871   : > { %v3848_v61 = vpop.eup %3847  ;;  %v1975_v1 = vadd.f32 %v3275_v47, %v1974_v56  ;;  %v3554_v11 = vpop.f32.mrb[35].mxu0  ;;  %v4653_v26 = vadd.f32 %v1972_v52, %v4414_v39 }
 0x872   : > { %v3850_v40 = vpop.eup %3849  ;;  %3508 = vmatmul.mubr.msk.bf16.vlgmr.msra.gmra.mrb[32].mxu1 %vm973_vm3, %v1566_v59  ;;  %v1562_v10 = vmul.f32 %v3848_v61, %v3840_v12 }
 0x873   : > { %3518 = vmatpush3.bf16.msra.mxu1 %v1665_v21  ;;  %v2139_v44 = vsel %vm973_vm3, %v4653_v26, -inf  ;;  %v2132_v8 = vadd.f32 %v1975_v1, %v4421_v3  ;;  %3519 = vmatprep.mubr.msk.bf16.mxu1 %vm4024_vm1, %v4023_v19  ;;  %v1563_v15 = vmul.f32 %v3850_v40, %v3842_v42 }
 0x874   : > { %2140 = vmax.xlane.f32.xlu1 %v2139_v44 }
 0x875   : > { %v2142_v16 = vsel %vm973_vm3, %v2132_v8, -inf  ;;  %v1568_v60 = vpack.c.bf16 %v1563_v15, %v1562_v10 }
 0x876   : > { %v2022_v39 = vpop.f32.mrb[36].mxu0  ;;  %2143 = vmax.xlane.f32.xlu0 %v2142_v16 }
 0x877   : > { %v2023_v18 = vadd.f32 %v3274_v41, %v2022_v39  ;;  %v3559_v23 = vpop.f32.mrb[37].mxu0 }
 0x878   : > { %v2025_v24 = vpop.f32.mrb[38].mxu0 }
 0x879   : > { %v2026_v30 = vadd.f32 %v3275_v47, %v2025_v24  ;;  %v3560_v34 = vpop.f32.mrb[39].mxu0  ;;  %v2133_v46 = vadd.f32 %v2023_v18, %v4359_v4 }
 0x87a   : > { %3520 = vmatmul.mubr.msk.bf16.vlgmr.msra.gmra.mrb[36].mxu1 %vm973_vm3, %v1568_v60 }
 0x87b   : > { %v2145_v3 = vsel %vm973_vm3, %v2133_v46, -inf  ;;  %v2134_v12 = vadd.f32 %v2026_v30, %v4370_v9 }
 0x87c   : > { %2146 = vmax.xlane.f32.xlu0 %v2145_v3 }
 0x87d   : > { %v2148_v42 = vsel %vm973_vm3, %v2134_v12, -inf }
 0x87e   : > { %v2073_v49 = vpop.f32.mrb[40].mxu0  ;;  %2149 = vmax.xlane.f32.xlu1 %v2148_v42 }
 0x87f   : > { %v2074_v50 = vadd.f32 %v3274_v41, %v2073_v49  ;;  %v3565_v43 = vpop.f32.mrb[41].mxu0 }
 0x880   : > { %v2076_v52 = vpop.f32.mrb[42].mxu0 }
 0x881   : > { %v2077_v31 = vadd.f32 %v3275_v47, %v2076_v52  ;;  %v3566_v56 = vpop.f32.mrb[43].mxu0  ;;  %v2135_v59 = vadd.f32 %v2074_v50, %v4435_v63 }
 0x883   : > { %v2151_v4 = vsel %vm973_vm3, %v2135_v59, -inf  ;;  %v2136_v61 = vadd.f32 %v2077_v31, %v4428_v62  ;;  %v1762_v62 = vld [vmem:[#allocation2 + $0x4] sm:$0xf] }
 0x884   : > { %2152 = vmax.xlane.f32.xlu0 %v2151_v4  ;;  %3689 = vmatprep.subr.msk.bf16.mxu1 %vm1775_vm4, %v1762_v62 }
 0x885   : > { %v2154_v1 = vsel %vm973_vm3, %v2136_v61, -inf }
 0x886   : > { %v2124_v9 = vpop.f32.mrb[44].mxu0  ;;  %2155 = vmax.xlane.f32.xlu1 %v2154_v1 }
 0x887   : > { %v2125_v11 = vadd.f32 %v3274_v41, %v2124_v9  ;;  %v3571_v40 = vpop.f32.mrb[45].mxu0  ;;  %v4681_v41 = vld [vmem:[#allocation2] sm:$0xf] }
 0x888   : > { %v2127_v21 = vpop.f32.mrb[46].mxu0 }
 0x889   : > { %v2128_v44 = vadd.f32 %v3275_v47, %v2127_v21  ;;  %v3572_v10 = vpop.f32.mrb[47].mxu0  ;;  %v2137_v15 = vadd.f32 %v2125_v11, %v4380_v0  ;;  %v1777_v0 = vsel %vm1775_vm4, %v1762_v62, 0 }
 0x88a   : > { %3530 = vmatpush3.bf16.msra.mxu1 %v1777_v0 }
 0x88b   : > { %v2157_v16 = vsel %vm973_vm3, %v2137_v15, -inf  ;;  %v2138_v63 = vadd.f32 %v2128_v44, %v4386_v25  ;;  %3690 = vmatprep.subr.msk.bf16.mxu1 %vm1775_vm4, %v4681_v41 }
 0x88c   : > { %2158 = vmax.xlane.f32.xlu0 %v2157_v16 }
 0x88d   : > { %v2160_v39 = vsel %vm973_vm3, %v2138_v63, -inf }
 0x88e   : > { %2161 = vmax.xlane.f32.xlu1 %v2160_v39 }
 0x89f   : > { %2278 = vrot.lane.b32.xlu1 %v4303_v33, %s4032_s18 }
 0x8a2   : > { %2231 = vrot.lane.b32.xlu0 %v4305_v36, %s4032_s18 }
 0x901   : > { %v2141_v25 = vpop.xlane.xlu1 %2140 }
 0x902   : > { %v2163_v47 = vsub.f32 %v4653_v26, %v2141_v25 }
 0x903   : > { %v2144_v18 = vpop.xlane.xlu0 %2143 }
 0x904   : > { %v2171_v23 = vmul.f32 1.442695, %v2163_v47  ;;  %v2164_v24 = vsub.f32 %v2132_v8, %v2144_v18 }
 0x906   : > { %3851 = vpow2.f32 %v2171_v23  ;;  %v2173_v60 = vmul.f32 1.442695, %v2164_v24 }
 0x908   : > { %3853 = vpow2.f32 %v2173_v60 }
 0x909   : > { %v2147_v30 = vpop.xlane.xlu0 %2146 }
 0x90a   : > { %v2165_v34 = vsub.f32 %v2133_v46, %v2147_v30 }
 0x90b   : > { %v2150_v3 = vpop.xlane.xlu1 %2149 }
 0x90c   : > { %v2175_v42 = vmul.f32 1.442695, %v2165_v34  ;;  %v2166_v49 = vsub.f32 %v2134_v12, %v2150_v3 }
 0x90e   : > { %3855 = vpow2.f32 %v2175_v42  ;;  %v2177_v50 = vmul.f32 1.442695, %v2166_v49  ;;  %v1857_v49 = vsel %vm1775_vm4, %v4681_v41, 0 }
 0x910   : > { %v4686_v43 = vpop.eup %3851  ;;  %3857 = vpow2.f32 %v2177_v50 }
 0x911   : > { %v2153_v52 = vpop.xlane.xlu0 %2152  ;;  %v2187_v26 = vsel %vm973_vm3, %v4686_v43, 0.0 }
 0x912   : > { %v4690_v31 = vpop.eup %3853  ;;  %v2167_v8 = vsub.f32 %v2135_v59, %v2153_v52  ;;  %2188 = vadd.xlane.f32.xlu0 %v2187_v26 }
 0x913   : > { %v2156_v56 = vpop.xlane.xlu1 %2155  ;;  %v2190_v46 = vsel %vm973_vm3, %v4690_v31, 0.0 }
 0x914   : > { %v2179_v4 = vmul.f32 1.442695, %v2167_v8  ;;  %v2168_v1 = vsub.f32 %v2136_v61, %v2156_v56  ;;  %2191 = vadd.xlane.f32.xlu1 %v2190_v46 }
 0x916   : > { %3859 = vpow2.f32 %v2179_v4  ;;  %v2181_v12 = vmul.f32 1.442695, %v2168_v1 }
 0x918   : > { %v4694_v9 = vpop.eup %3855  ;;  %3861 = vpow2.f32 %v2181_v12 }
 0x919   : > { %v2159_v11 = vpop.xlane.xlu0 %2158  ;;  %v2193_v40 = vsel %vm973_vm3, %v4694_v9, 0.0 }
 0x91a   : > { %v4698_v21 = vpop.eup %3857  ;;  %v2169_v59 = vsub.f32 %v2137_v15, %v2159_v11  ;;  %2194 = vadd.xlane.f32.xlu0 %v2193_v40 }
 0x91b   : > { %v2162_v44 = vpop.xlane.xlu1 %2161  ;;  %v2196_v10 = vsel %vm973_vm3, %v4698_v21, 0.0 }
 0x91c   : > { %v2183_v16 = vmul.f32 1.442695, %v2169_v59  ;;  %v2170_v61 = vsub.f32 %v2138_v63, %v2162_v44  ;;  %2197 = vadd.xlane.f32.xlu1 %v2196_v10 }
 0x91e   : > { %3863 = vpow2.f32 %v2183_v16  ;;  %v2185_v39 = vmul.f32 1.442695, %v2170_v61 }
 0x91f   : > { %v2279_v62 = vpop.permute.xlu1 %2278 }
 0x920   : > { %v4702_v0 = vpop.eup %3859  ;;  %3865 = vpow2.f32 %v2185_v39  ;;  %3580 = vmatpush3.bf16.msra.mxu0 %v2279_v62 }
 0x921   : > { %v2199_v25 = vsel %vm973_vm3, %v4702_v0, 0.0  ;;  %3591 = vmatprep.subr.bf16.mxu0 %v4023_v19 }
 0x922   : > { %v4707_v15 = vpop.eup %3861  ;;  %2200 = vadd.xlane.f32.xlu0 %v2199_v25  ;;  %v2423_v25 = vld [vmem:[#allocation2 + $0x8] sm:$0xf] }
 0x923   : > { %v2202_v47 = vsel %vm973_vm3, %v4707_v15, 0.0 }
 0x924   : > { %2203 = vadd.xlane.f32.xlu1 %v2202_v47 }
 0x928   : > { %v4711_v63 = vpop.eup %3863 }
 0x929   : > { %v2205_v18 = vsel %vm973_vm3, %v4711_v63, 0.0 }
 0x92a   : > { %v4715_v23 = vpop.eup %3865  ;;  %2206 = vadd.xlane.f32.xlu0 %v2205_v18 }
 0x92b   : > { %v2208_v24 = vsel %vm973_vm3, %v4715_v23, 0.0 }
 0x92c   : > { %2209 = vadd.xlane.f32.xlu1 %v2208_v24 }
 0x93d   : > { %2325 = vrot.lane.b32.xlu1 %v4315_v53, %s4032_s18 }
 0x940   : > { %2372 = vrot.lane.b32.xlu0 %v4313_v51, %s4032_s18  ;;  %s4893_s18 = scalar_lea.hbm %s4948_s10, %s3312_s28 }
 0x941   : > { %2517 = vrot.lane.b32.xlu1 %v4305_v36, %s4033_s20 }
 0x944   : > { %2515 = vrot.lane.b32.xlu0 %v4310_v38, %s4034_s27 }
 0x945   : > { %2568 = vrot.lane.b32.xlu1 %v4303_v33, %s4033_s20  ;;  %v1610_v60 = vpop.f32.mrb[32].mxu1 }
 0x946   : > { %v3509_v30 = vpop.f32.mrb[33].mxu1 }
 0x947   : > { %v1613_v34 = vpop.f32.mrb[34].mxu1 }
 0x948   : > { %v1758_v3 = vpack.c.bf16 %v1613_v34, %v1610_v60  ;;  %2619 = vrot.lane.b32.xlu0 %v4315_v53, %s4033_s20  ;;  %v3510_v42 = vpop.f32.mrb[35].mxu1 }
 0x949   : > { %2566 = vrot.lane.b32.xlu1 %v4307_v37, %s4034_s27 }
 0x94a   : > { %3531 = vmatprep.mubr.msk.bf16.mxu1 %vm767_vm2, %v1758_v3 }
 0x94b   : > { %3532 = vmatmul.mubr.msk.bf16.vlgmr.msra.gmra.mrb[40].mxu1 %vm767_vm2, %v1759_v13 }
 0x94c   : > { %2670 = vrot.lane.b32.xlu0 %v4313_v51, %s4033_s20  ;;  %3540 = vmatpush3.bf16.msra.mxu1 %v1857_v49  ;;  %s4035_s20 = smov 40  }
 0x94d   : > { %2617 = vrot.lane.b32.xlu1 %v4320_v22, %s4034_s27  ;;  %v1704_v38 = vpop.f32.mrb[36].mxu1  ;;  %3573 = vmatprep.subr.bf16.mxu1 %v4023_v19  ;;  %v2232_v22 = vpop.permute.xlu0 %2231 }
 0x94e   : > { %v3521_v50 = vpop.f32.mrb[37].mxu1 }
 0x94f   : > { %v1707_v37 = vpop.f32.mrb[38].mxu1 }
 0x950   : > { %v1760_v52 = vpack.c.bf16 %v1707_v37, %v1704_v38  ;;  %2668 = vrot.lane.b32.xlu0 %v4317_v54, %s4034_s27  ;;  %v3522_v41 = vpop.f32.mrb[39].mxu1  ;;  %s386_s27 = sand.u32 1, %s4009_s14  }
 0x951   : > { %s3230_s25 = sshll.u32 %s386_s27, 6  ;;  %s4897_s17 = scalar_lea.sflag [#allocation4], %s386_s27 }
 0x952   : > { %3535 = vmatprep.mubr.msk.bf16.mxu1 %vm767_vm2, %v1760_v52  ;;  %s388_s11 = scalar_lea.vmem [#allocation5], %s3230_s25  ;;  %s4036_s25 = smov [#allocation5]  }
 0x953   : > { %3536 = vmatmul.mubr.msk.bf16.gmra.mrb[44].mxu1 %vm767_vm2, %v1761_v48  ;;  %s3138_s29 = sshll.u32 %s388_s11, 4  ;;  %s3955_s21 = sshll.u32 %s4036_s25, 4  ;;  %s4888_s29 = int_to_ptr.vmem [resolvable:$true] %s3138_s29  ;;  %s3956_s21 = int_to_ptr.vmem [resolvable:$false] %s3955_s21 }
 0x954   : > { %3541 = vmatprep.mubr.msk.bf16.mxu1 %vm767_vm2, %v1254_v58  ;;  %s3957_s26 = scalar_lea.vmem %s3956_s21, 2048  ;;  %p3958_p2 = scmp.lt.s32.totalorder %s4888_s29, %s3956_s21 }
 0x95b   : > { %3542 = vmatmul.mubr.msk.bf16.vlgmr.msra.gmra.mrb[40].mxu1 %vm767_vm2, %v1255_v14 }
 0x95c   : > { %3574 = vmatpush3.bf16.msra.mxu1 %v2232_v22  ;;  %3545 = vmatprep.mubr.msk.bf16.mxu1 %vm767_vm2, %v1256_v6 }
 0x95d   : > { %3585 = vmatprep.subr.bf16.mxu1 %v4023_v19 }
 0x963   : > { %3546 = vmatmul.mubr.msk.bf16.gmra.mrb[44].mxu1 %vm767_vm2, %v1257_v29 }
 0x964   : > { %3575 = vmatprep.mubr.msk.bf16.mxu1 %vm4024_vm1, %v4023_v19 }
 0x99f   : > { %v2189_v54 = vpop.xlane.xlu0 %2188 }
 0x9a0   : > { %3867 = vrcp.f32 %v2189_v54 }
 0x9a1   : > { %v2192_v7 = vpop.xlane.xlu1 %2191 }
 0x9a2   : > { %3869 = vrcp.f32 %v2192_v7 }
 0x9a7   : > { %v2195_v2 = vpop.xlane.xlu0 %2194 }
 0x9a8   : > { %3871 = vrcp.f32 %v2195_v2 }
 0x9a9   : > { %v2198_v14 = vpop.xlane.xlu1 %2197 }
 0x9aa   : > { %v3868_v55 = vpop.eup %3867  ;;  %3873 = vrcp.f32 %v2198_v14 }
 0x9ab   : > { %v2219_v58 = vmul.f32 %v3868_v55, %v4686_v43  ;;  %v3288_v55 = vld [vmem:[%s4946_s8 + $0x30] sm:$0xff] }
 0x9ac   : > { %v3870_v57 = vpop.eup %3869 }
 0x9ad   : > { %v2220_v32 = vmul.f32 %v3870_v57, %v4690_v31 }
 0x9af   : > { %v2227_v20 = vpack.c.bf16 %v2220_v32, %v2219_v58  ;;  %v2201_v28 = vpop.xlane.xlu0 %2200  ;;  %v3289_v58 = vld [vmem:[%s4946_s8 + $0x38] sm:$0xff] }
 0x9b0   : > { %3875 = vrcp.f32 %v2201_v28 }
 0x9b1   : > { %v2204_v29 = vpop.xlane.xlu1 %2203  ;;  %3576 = vmatmul.mubr.msk.bf16.vlgmr.msra.gmra.mrb[48].mxu1 %vm973_vm3, %v2227_v20 }
 0x9b2   : > { %v3872_v5 = vpop.eup %3871  ;;  %3877 = vrcp.f32 %v2204_v29  ;;  %3587 = vmatprep.mubr.msk.bf16.mxu1 %vm4024_vm1, %v4023_v19  ;;  %v3915_v29 = vld [vmem:[%s4947_s9] sm:$0xff] }
 0x9b3   : > { %v2221_v35 = vmul.f32 %v3872_v5, %v4694_v9 }
 0x9b4   : > { %v3874_v6 = vpop.eup %3873 }
 0x9b5   : > { %v2222_v45 = vmul.f32 %v3874_v6, %v4698_v21 }
 0x9b7   : > { %v2207_v13 = vpop.xlane.xlu0 %2206  ;;  %v2228_v17 = vpack.c.bf16 %v2222_v45, %v2221_v35 }
 0x9b8   : > { %3879 = vrcp.f32 %v2207_v13  ;;  %v3916_v13 = vld [vmem:[%s4947_s9 + $0x8] sm:$0xff] }
 0x9b9   : > { %3582 = vmatmul.mubr.msk.bf16.vlgmr.msra.gmra.mrb[48].mxu0 %vm973_vm3, %v2228_v17  ;;  %v2210_v27 = vpop.xlane.xlu1 %2209 }
 0x9ba   : > { %v3876_v48 = vpop.eup %3875  ;;  %3881 = vrcp.f32 %v2210_v27  ;;  %3593 = vmatprep.mubr.msk.bf16.mxu0 %vm4024_vm1, %v4023_v19 }
 0x9bb   : > { %v2373_v43 = vpop.permute.xlu0 %2372  ;;  %v2223_v31 = vmul.f32 %v3876_v48, %v4702_v0 }
 0x9bc   : > { %v3878_v26 = vpop.eup %3877  ;;  %3592 = vmatpush3.bf16.msra.mxu0 %v2373_v43 }
 0x9bd   : > { %v2224_v8 = vmul.f32 %v3878_v26, %v4707_v15  ;;  %v2326_v56 = vpop.permute.xlu1 %2325  ;;  %3607 = vmatprep.subr.bf16.mxu0 %v4023_v19  ;;  %v2437_v15 = vsel %vm1775_vm4, %v2423_v25, 0 }
 0x9be   : > { %3586 = vmatpush3.bf16.msra.mxu1 %v2326_v56  ;;  %v3917_v56 = vld [vmem:[%s4947_s9 + $0x10] sm:$0xff] }
 0x9bf   : > { %v2229_v46 = vpack.c.bf16 %v2224_v8, %v2223_v31  ;;  %v2516_v59 = vpop.permute.xlu0 %2515  ;;  %3691 = vmatprep.subr.msk.bf16.mxu1 %vm1775_vm4, %v2423_v25 }
 0x9c1   : > { %3588 = vmatmul.mubr.msk.bf16.vlgmr.msra.gmra.mrb[52].mxu1 %vm973_vm3, %v2229_v46  ;;  %v2518_v11 = vpop.permute.xlu1 %2517 }
 0x9c2   : > { %v3880_v4 = vpop.eup %3879  ;;  %v2523_v21 = vsel %vm767_vm2, %v2518_v11, 0  ;;  %3598 = vmatpush3.bf16.msra.mxu1 %v2437_v15 }
 0x9c3   : > { %v2225_v12 = vmul.f32 %v3880_v4, %v4711_v63  ;;  %v2620_v10 = vpop.permute.xlu0 %2619  ;;  %3619 = vmatprep.subr.bf16.mxu1 %v4023_v19 }
 0x9c4   : > { %v3882_v1 = vpop.eup %3881  ;;  %v2625_v49 = vsel %vm767_vm2, %v2620_v10, 0 }
 0x9c5   : > { %v2226_v9 = vmul.f32 %v3882_v1, %v4715_v23  ;;  %v2569_v44 = vpop.permute.xlu1 %2568 }
 0x9c6   : > { %v2574_v16 = vsel %vm767_vm2, %v2569_v44, 0 }
 0x9c7   : > { %v2230_v40 = vpack.c.bf16 %v2226_v9, %v2225_v12  ;;  %v2671_v61 = vpop.permute.xlu0 %2670  ;;  %v3918_v12 = vld [vmem:[%s4947_s9 + $0x18] sm:$0xff] }
 0x9c8   : > { %v2676_v62 = vsel %vm767_vm2, %v2671_v61, 0 }
 0x9c9   : > { %3594 = vmatmul.mubr.msk.bf16.vlgmr.msra.gmra.mrb[52].mxu0 %vm973_vm3, %v2230_v40  ;;  %v2567_v39 = vpop.permute.xlu1 %2566 }
 0x9ca   : > { %3608 = vmatpush3.bf16.xpose.msra.mxu0 %v2523_v21  ;;  %3609 = vmatprep.mubr.msk.bf16.mxu0 %vm4024_vm1, %v4023_v19 }
 0x9cb   : > { %3613 = vmatprep.subr.bf16.mxu0 %v4023_v19  ;;  %v2669_v0 = vpop.permute.xlu0 %2668 }
 0x9cd   : > { %v2618_v45 = vpop.permute.xlu1 %2617 }
 0x9d1   : > { %3610 = vmatmul.mubr.msk.bf16.vlgmr.msra.gmra.mrb[56].mxu0 %vm767_vm2, %v2516_v59 }
 0x9d2   : > { %3614 = vmatpush3.bf16.xpose.msra.mxu0 %v2574_v16  ;;  %3615 = vmatprep.mubr.msk.bf16.mxu0 %vm4024_vm1, %v4023_v19 }
 0x9d3   : > { %3625 = vmatprep.subr.bf16.mxu0 %v4023_v19 }
 0x9d9   : > { %3616 = vmatmul.mubr.msk.bf16.vlgmr.msra.gmra.mrb[60].mxu0 %vm767_vm2, %v2567_v39 }
 0x9da   : > { %3626 = vmatpush3.bf16.xpose.msra.mxu0 %v2676_v62  ;;  %3627 = vmatprep.mubr.msk.bf16.mxu0 %vm4024_vm1, %v4023_v19 }
 0x9db   : > { %3637 = vmatprep.subr.bf16.mxu0 %v4023_v19 }
 0x9e1   : > { %3628 = vmatmul.mubr.msk.bf16.vlgmr.msra.gmra.mrb[64].mxu0 %vm767_vm2, %v2669_v0 }
 0x9e2   : > { %3639 = vmatprep.mubr.msk.bf16.mxu0 %vm4024_vm1, %v4023_v19 }
 0xa84   : > { %v2271_v47 = vpop.f32.mrb[48].mxu1 }
 0xa85   : > { %v3577_v63 = vpop.f32.mrb[49].mxu1 }
 0xa86   : > { %v2274_v18 = vpop.f32.mrb[50].mxu1 }
 0xa87   : > { %v2419_v23 = vpack.c.bf16 %v2274_v18, %v2271_v47  ;;  %v3578_v24 = vpop.f32.mrb[51].mxu1 }
 0xa89   : > { %3599 = vmatprep.mubr.msk.bf16.mxu1 %vm767_vm2, %v2419_v23 }
 0xa8c   : > { %v2318_v60 = vpop.f32.mrb[48].mxu0 }
 0xa8d   : > { %v3583_v30 = vpop.f32.mrb[49].mxu0 }
 0xa8e   : > { %v2321_v34 = vpop.f32.mrb[50].mxu0 }
 0xa8f   : > { %v2420_v3 = vpack.c.bf16 %v2321_v34, %v2318_v60  ;;  %v3584_v42 = vpop.f32.mrb[51].mxu0 }
 0xa91   : > { %3600 = vmatmul.mubr.msk.bf16.vlgmr.msra.gmra.mrb[40].mxu1 %vm767_vm2, %v2420_v3 }
 0xa92   : > { %3620 = vmatpush3.bf16.xpose.msra.mxu1 %v2625_v49 }
 0xa93   : > { %3631 = vmatprep.subr.bf16.mxu1 %v4023_v19 }
 0xa94   : > { %v2365_v38 = vpop.f32.mrb[52].mxu1 }
 0xa95   : > { %v3589_v50 = vpop.f32.mrb[53].mxu1 }
 0xa96   : > { %v2368_v37 = vpop.f32.mrb[54].mxu1 }
 0xa97   : > { %v2421_v52 = vpack.c.bf16 %v2368_v37, %v2365_v38  ;;  %v3590_v41 = vpop.f32.mrb[55].mxu1  ;;  %v3919_v38 = vld [vmem:[%s4947_s9 + $0x20] sm:$0xff] }
 0xa98   : > { %v3920_v41 = vld [vmem:[%s4947_s9 + $0x30] sm:$0xff] }
 0xa99   : > { %3603 = vmatprep.mubr.msk.bf16.mxu1 %vm767_vm2, %v2421_v52 }
 0xa9c   : > { %v2412_v22 = vpop.f32.mrb[52].mxu0 }
 0xa9d   : > { %v3595_v54 = vpop.f32.mrb[53].mxu0 }
 0xa9e   : > { %v2415_v7 = vpop.f32.mrb[54].mxu0  ;;  %v3921_v54 = vld [vmem:[%s4947_s9 + $0x28] sm:$0xff] }
 0xa9f   : > { %v2422_v2 = vpack.c.bf16 %v2415_v7, %v2412_v22  ;;  %v3596_v14 = vpop.f32.mrb[55].mxu0 }
 0xaa0   : > { %v3922_v14 = vld [vmem:[%s4947_s9 + $0x38] sm:$0xff] }
 0xaa1   : > { %3604 = vmatmul.mubr.msk.bf16.gmra.mrb[44].mxu1 %vm767_vm2, %v2422_v2 }
 0xaa2   : > { %3621 = vmatprep.mubr.msk.bf16.mxu1 %vm4024_vm1, %v4023_v19 }
 0xaa4   : > { %v2559_v57 = vpop.f32.mrb[56].mxu0 }
 0xaa5   : > { %v2560_v32 = vadd.f32 %v3288_v55, %v2559_v57  ;;  %v3611_v20 = vpop.f32.mrb[57].mxu0 }
 0xaa6   : > { %v2562_v28 = vpop.f32.mrb[58].mxu0 }
 0xaa7   : > { %v2719_v5 = vadd.f32 %v3915_v29, %v2560_v32  ;;  %v2563_v6 = vadd.f32 %v3289_v58, %v2562_v28  ;;  %v3612_v35 = vpop.f32.mrb[59].mxu0 }
 0xaa9   : > { %v2720_v17 = vadd.f32 %v3916_v13, %v2563_v6  ;;  %3622 = vmatmul.mubr.msk.bf16.vlgmr.msra.gmra.mrb[56].mxu1 %vm767_vm2, %v2618_v45  ;;  %v2727_v27 = vsel %vm973_vm3, %v2719_v5, -inf }
 0xaaa   : > { %2728 = vmax.xlane.f32.xlu1 %v2727_v27  ;;  %3633 = vmatprep.mubr.msk.bf16.mxu1 %vm4024_vm1, %v4023_v19 }
 0xaab   : > { %v2730_v48 = vsel %vm973_vm3, %v2720_v17, -inf }
 0xaac   : > { %2731 = vmax.xlane.f32.xlu0 %v2730_v48  ;;  %v2610_v43 = vpop.f32.mrb[60].mxu0 }
 0xaad   : > { %v2611_v26 = vadd.f32 %v3288_v55, %v2610_v43  ;;  %v3617_v31 = vpop.f32.mrb[61].mxu0 }
 0xaae   : > { %v2613_v8 = vpop.f32.mrb[62].mxu0 }
 0xaaf   : > { %v2721_v46 = vadd.f32 %v3917_v56, %v2611_v26  ;;  %v2614_v4 = vadd.f32 %v3289_v58, %v2613_v8  ;;  %v3618_v1 = vpop.f32.mrb[63].mxu0 }
 0xab1   : > { %v2722_v9 = vadd.f32 %v3918_v12, %v2614_v4  ;;  %v2733_v11 = vsel %vm973_vm3, %v2721_v46, -inf }
 0xab2   : > { %2734 = vmax.xlane.f32.xlu0 %v2733_v11 }
 0xab3   : > { %v2736_v40 = vsel %vm973_vm3, %v2722_v9, -inf }
 0xab4   : > { %2737 = vmax.xlane.f32.xlu1 %v2736_v40  ;;  %v2712_v21 = vpop.f32.mrb[64].mxu0 }
 0xab5   : > { %v3629_v59 = vpop.f32.mrb[65].mxu0  ;;  %v2713_v60 = vadd.f32 %v3288_v55, %v2712_v21 }
 0xab6   : > { %v2715_v44 = vpop.f32.mrb[66].mxu0 }
 0xab7   : > { %v3630_v10 = vpop.f32.mrb[67].mxu0  ;;  %v2716_v49 = vadd.f32 %v3289_v58, %v2715_v44  ;;  %v2725_v22 = vadd.f32 %v3920_v41, %v2713_v60 }
 0xb37   : > { %v2729_v16 = vpop.xlane.xlu1 %2728 }
 0xb38   : > { %v2751_v39 = vsub.f32 %v2719_v5, %v2729_v16 }
 0xb39   : > { %v2732_v61 = vpop.xlane.xlu0 %2731 }
 0xb3a   : > { %v2752_v0 = vsub.f32 %v2720_v17, %v2732_v61  ;;  %v2759_v15 = vmul.f32 1.442695, %v2751_v39 }
 0xb3c   : > { %v2761_v63 = vmul.f32 1.442695, %v2752_v0  ;;  %3883 = vpow2.f32 %v2759_v15 }
 0xb3e   : > { %3885 = vpow2.f32 %v2761_v63 }
 0xb3f   : > { %v2735_v62 = vpop.xlane.xlu0 %2734 }
 0xb40   : > { %v2753_v47 = vsub.f32 %v2721_v46, %v2735_v62 }
 0xb41   : > { %v2738_v25 = vpop.xlane.xlu1 %2737 }
 0xb42   : > { %v2754_v18 = vsub.f32 %v2722_v9, %v2738_v25  ;;  %v2763_v23 = vmul.f32 1.442695, %v2753_v47 }
 0xb44   : > { %v2765_v3 = vmul.f32 1.442695, %v2754_v18  ;;  %3887 = vpow2.f32 %v2763_v23 }
 0xb46   : > { %3889 = vpow2.f32 %v2765_v3  ;;  %v4848_v32 = vpop.eup %3883 }
 0xb47   : > { %v2775_v29 = vsel %vm973_vm3, %v4848_v32, 0.0 }
 0xb48   : > { %v3886_v28 = vpop.eup %3885 }
 0xb49   : > { %v2778_v6 = vsel %vm973_vm3, %v3886_v28, 0.0 }
 0xb4e   : > { %v3888_v5 = vpop.eup %3887 }
 0xb4f   : > { %v2781_v45 = vsel %vm973_vm3, %v3888_v5, 0.0 }
 0xb50   : > { %v3890_v35 = vpop.eup %3889 }
 0xb51   : > { %v2784_v13 = vsel %vm973_vm3, %v3890_v35, 0.0 }
 0xb7c   : > { %v2661_v24 = vpop.f32.mrb[56].mxu1 }
 0xb7d   : > { %v2662_v30 = vadd.f32 %v3288_v55, %v2661_v24  ;;  %v3623_v34 = vpop.f32.mrb[57].mxu1  ;;  %v2726_v55 = vadd.f32 %v3922_v14, %v2716_v49 }
 0xb7e   : > { %v2664_v42 = vpop.f32.mrb[58].mxu1 }
 0xb7f   : > { %v2723_v50 = vadd.f32 %v3919_v38, %v2662_v30  ;;  %v2665_v37 = vadd.f32 %v3289_v58, %v2664_v42  ;;  %v3624_v52 = vpop.f32.mrb[59].mxu1  ;;  %v2745_v58 = vsel %vm973_vm3, %v2725_v22, -inf  ;;  %v2748_v20 = vsel %vm973_vm3, %v2726_v55, -inf }
 0xb81   : > { %v2724_v7 = vadd.f32 %v3921_v54, %v2665_v37  ;;  %v2739_v2 = vsel %vm973_vm3, %v2723_v50, -inf }
 0xb82   : > { %2740 = vmax.xlane.f32.xlu0 %v2739_v2 }
 0xb83   : > { %v2742_v57 = vsel %vm973_vm3, %v2724_v7, -inf }
 0xb84   : > { %2743 = vmax.xlane.f32.xlu1 %v2742_v57 }
 0xb86   : > { %2746 = vmax.xlane.f32.xlu0 %v2745_v58 }
 0xb88   : > { %2749 = vmax.xlane.f32.xlu1 %v2748_v20 }
 0xb8a   : > { %2776 = vadd.xlane.f32.xlu0 %v2775_v29 }
 0xb8c   : > { %2779 = vadd.xlane.f32.xlu1 %v2778_v6 }
 0xb8e   : > { %2782 = vadd.xlane.f32.xlu0 %v2781_v45 }
 0xb90   : > { %2785 = vadd.xlane.f32.xlu1 %v2784_v13 }
 0xc0f   : > { %v2741_v17 = vpop.xlane.xlu0 %2740 }
 0xc10   : > { %v2755_v9 = vsub.f32 %v2723_v50, %v2741_v17 }
 0xc11   : > { %v2744_v27 = vpop.xlane.xlu1 %2743 }
 0xc12   : > { %v2756_v11 = vsub.f32 %v2724_v7, %v2744_v27  ;;  %v2767_v40 = vmul.f32 1.442695, %v2755_v9 }
 0xc13   : > { %v2747_v48 = vpop.xlane.xlu0 %2746 }
 0xc14   : > { %v2757_v43 = vsub.f32 %v2725_v22, %v2747_v48  ;;  %v2769_v21 = vmul.f32 1.442695, %v2756_v11 }
 0xc15   : > { %v2750_v26 = vpop.xlane.xlu1 %2749 }
 0xc16   : > { %v2771_v31 = vmul.f32 1.442695, %v2757_v43  ;;  %v2758_v8 = vsub.f32 %v2726_v55, %v2750_v26  ;;  %v3011_v55 = vld [vmem:[#allocation2 + $0xc] sm:$0xf] }
 0xc17   : > { %v3025_v57 = vsel %vm1775_vm4, %v3011_v55, 0 }
 0xc18   : > { %3891 = vpow2.f32 %v2771_v31  ;;  %v2773_v56 = vmul.f32 1.442695, %v2758_v8 }
 0xc1a   : > { %3893 = vpow2.f32 %v2773_v56 }
 0xc1b   : > { %3895 = vpow2.f32 %v2767_v40 }
 0xc1c   : > { %3897 = vpow2.f32 %v2769_v21 }
 0xc22   : > { %v3892_v46 = vpop.eup %3891 }
 0xc23   : > { %v2793_v4 = vsel %vm973_vm3, %v3892_v46, 0.0 }
 0xc24   : > { %v3894_v1 = vpop.eup %3893  ;;  %2794 = vadd.xlane.f32.xlu0 %v2793_v4 }
 0xc25   : > { %v2796_v12 = vsel %vm973_vm3, %v3894_v1, 0.0  ;;  %v3896_v59 = vpop.eup %3895 }
 0xc26   : > { %2797 = vadd.xlane.f32.xlu1 %v2796_v12  ;;  %v3898_v44 = vpop.eup %3897  ;;  %v2787_v10 = vsel %vm973_vm3, %v3896_v59, 0.0 }
 0xc27   : > { %v2790_v16 = vsel %vm973_vm3, %v3898_v44, 0.0 }
 0xc37   : > { %2866 = vrot.lane.b32.xlu1 %v4303_v33, %s4035_s20  ;;  %v2780_v33 = vpop.xlane.xlu1 %2779 }
 0xc38   : > { %3899 = vrcp.f32 %v2780_v33 }
 0xc3a   : > { %2819 = vrot.lane.b32.xlu0 %v4305_v36, %s4035_s20  ;;  %v2777_v36 = vpop.xlane.xlu0 %2776 }
 0xc3b   : > { %v2786_v61 = vpop.xlane.xlu1 %2785  ;;  %3901 = vrcp.f32 %v2777_v36 }
 0xc3c   : > { %3903 = vrcp.f32 %v2786_v61 }
 0xc3e   : > { %v2783_v39 = vpop.xlane.xlu0 %2782 }
 0xc3f   : > { %3905 = vrcp.f32 %v2783_v39 }
 0xc42   : > { %v3900_v62 = vpop.eup %3899 }
 0xc43   : > { %v2808_v47 = vmul.f32 %v3900_v62, %v3886_v28 }
 0xc45   : > { %v3902_v0 = vpop.eup %3901 }
 0xc46   : > { %v3904_v15 = vpop.eup %3903  ;;  %v2807_v23 = vmul.f32 %v3902_v0, %v4848_v32 }
 0xc48   : > { %v2815_v30 = vpack.c.bf16 %v2808_v47, %v2807_v23 }
 0xc49   : > { %v3906_v18 = vpop.eup %3905 }
 0xc59   : > { %2788 = vadd.xlane.f32.xlu0 %v2787_v10 }
 0xc5b   : > { %2791 = vadd.xlane.f32.xlu1 %v2790_v16 }
 0xc6c   : > { %2913 = vrot.lane.b32.xlu1 %v4315_v53, %s4035_s20  ;;  %v2810_v53 = vmul.f32 %v3904_v15, %v3890_v35 }
 0xc6f   : > { %2960 = vrot.lane.b32.xlu0 %v4313_v51, %s4035_s20  ;;  %v2809_v51 = vmul.f32 %v3906_v18, %v3888_v5  ;;  %s3951_s20 = scalar_lea.vmem %s4888_s29, 1024 }
 0xc70   : > { %p3952_p6 = scmp.ne.s32.totalorder %s4888_s29, %s3951_s20  ;;  %p3959_p3 = scmp.lt.s32.totalorder %s3957_s26, %s3951_s20 }
 0xc71   : > { %v2816_v34 = vpack.c.bf16 %v2810_v53, %v2809_v51 }
 0xc72   : > { %p3953_p10 = pnand %p3952_p6, %p4959_p9  ;;  %p3960_p4 = por %p3959_p3, %p3958_p2 }
 0xc74   : > { %p3954_p12 = pneg %p3953_p10 }
 0xc76   : > { %p3961_p7 = pnand %p3960_p4, %p3954_p12 }
 0xcb1   : > { %v2795_v25 = vpop.xlane.xlu0 %2794 }
 0xcb3   : > { %v2798_v63 = vpop.xlane.xlu1 %2797 }
 0xcb4   : > { %3907 = vrcp.f32 %v2798_v63 }
 0xcb5   : > { %v2820_v24 = vpop.permute.xlu0 %2819  ;;  %3909 = vrcp.f32 %v2795_v25 }
 0xcb6   : > { %3632 = vmatpush3.bf16.msra.mxu1 %v2820_v24 }
 0xcb7   : > { %v2867_v60 = vpop.permute.xlu1 %2866  ;;  %3643 = vmatprep.subr.bf16.mxu1 %v4023_v19 }
 0xcb8   : > { %3638 = vmatpush3.bf16.msra.mxu0 %v2867_v60 }
 0xcb9   : > { %3634 = vmatmul.mubr.msk.bf16.vlgmr.msra.gmra.mrb[60].mxu1 %vm973_vm3, %v2815_v30  ;;  %3649 = vmatprep.subr.bf16.mxu0 %v4023_v19 }
 0xcba   : > { %3645 = vmatprep.mubr.msk.bf16.mxu1 %vm4024_vm1, %v4023_v19 }
 0xcbb   : > { %3640 = vmatmul.mubr.msk.bf16.vlgmr.msra.gmra.mrb[68].mxu0 %vm973_vm3, %v2816_v34 }
 0xcbc   : > { %3651 = vmatprep.mubr.msk.bf16.mxu0 %vm4024_vm1, %v4023_v19 }
 0xcbe   : > { %v3908_v3 = vpop.eup %3907 }
 0xcbf   : > { %v3910_v49 = vpop.eup %3909  ;;  %v2814_v38 = vmul.f32 %v3908_v3, %v3894_v1  ;;  %v3302_v1 = vld [vmem:[%s4945_s7] ss:$0 sm:$0xff] }
 0xcc0   : > { %v2813_v37 = vmul.f32 %v3910_v49, %v3892_v46 }
 0xcc2   : > { %v2818_v22 = vpack.c.bf16 %v2814_v38, %v2813_v37 }
 0xce6   : > { %v2789_v42 = vpop.xlane.xlu0 %2788 }
 0xce7   : > { %3911 = vrcp.f32 %v2789_v42 }
 0xce8   : > { %v2792_v50 = vpop.xlane.xlu1 %2791 }
 0xce9   : > { %3913 = vrcp.f32 %v2792_v50 }
 0xcea   : > { %v2961_v52 = vpop.permute.xlu0 %2960 }
 0xceb   : > { %3650 = vmatpush3.bf16.msra.mxu0 %v2961_v52 }
 0xcec   : > { %v2914_v41 = vpop.permute.xlu1 %2913 }
 0xced   : > { %3644 = vmatpush3.bf16.msra.mxu1 %v2914_v41 }
 0xcee   : > { %3652 = vmatmul.mubr.msk.bf16.vlgmr.msra.gmra.mrb[72].mxu0 %vm973_vm3, %v2818_v22  ;;  %3692 = vmatprep.subr.msk.bf16.mxu1 %vm1775_vm4, %v3011_v55 }
 0xcf1   : > { %v3912_v54 = vpop.eup %3911 }
 0xcf2   : > { %v2811_v19 = vmul.f32 %v3912_v54, %v3896_v59 }
 0xcf3   : > { %v3914_v7 = vpop.eup %3913 }
 0xcf4   : > { %v2812_v2 = vmul.f32 %v3914_v7, %v3898_v44 }
 0xcf6   : > { %v2817_v14 = vpack.c.bf16 %v2812_v2, %v2811_v19 }
 0xcf8   : > { %3646 = vmatmul.mubr.msk.bf16.vlgmr.msra.gmra.mrb[64].mxu1 %vm973_vm3, %v2817_v14 }
 0xcf9   : > { %3656 = vmatpush3.bf16.msra.mxu1 %v3025_v57 }
 0xd8c   : > { %v2859_v58 = vpop.f32.mrb[60].mxu1 }
 0xd8d   : > { %v3635_v32 = vpop.f32.mrb[61].mxu1 }
 0xd8e   : > { %v2862_v20 = vpop.f32.mrb[62].mxu1  ;;  %v2906_v28 = vpop.f32.mrb[68].mxu0 }
 0xd8f   : > { %v3007_v29 = vpack.c.bf16 %v2862_v20, %v2859_v58  ;;  %v3636_v5 = vpop.f32.mrb[63].mxu1  ;;  %v3641_v6 = vpop.f32.mrb[69].mxu0 }
 0xd90   : > { %v2909_v35 = vpop.f32.mrb[70].mxu0 }
 0xd91   : > { %v3008_v45 = vpack.c.bf16 %v2909_v35, %v2906_v28  ;;  %v3642_v13 = vpop.f32.mrb[71].mxu0  ;;  %3657 = vmatprep.mubr.msk.bf16.mxu1 %vm767_vm2, %v3007_v29 }
 0xd93   : > { %3658 = vmatmul.mubr.msk.bf16.vlgmr.msra.gmra.mrb[40].mxu1 %vm767_vm2, %v3008_v45 }
 0xdc1   : > { %v3000_v17 = vpop.f32.mrb[72].mxu0 }
 0xdc2   : > { %v3653_v27 = vpop.f32.mrb[73].mxu0 }
 0xdc3   : > { %v3003_v48 = vpop.f32.mrb[74].mxu0 }
 0xdc4   : > { %v3010_v43 = vpack.c.bf16 %v3003_v48, %v3000_v17  ;;  %v3654_v26 = vpop.f32.mrb[75].mxu0 }
 0xdcb   : > { %v2953_v31 = vpop.f32.mrb[64].mxu1 }
 0xdcc   : > { %v3647_v8 = vpop.f32.mrb[65].mxu1 }
 0xdcd   : > { %v2956_v56 = vpop.f32.mrb[66].mxu1 }
 0xdce   : > { %v3009_v46 = vpack.c.bf16 %v2956_v56, %v2953_v31  ;;  %v3648_v4 = vpop.f32.mrb[67].mxu1 }
 0xdd0   : > { %3661 = vmatprep.mubr.msk.bf16.mxu1 %vm767_vm2, %v3009_v46 }
 0xdd1   : > { %3662 = vmatmul.mubr.msk.bf16.gmra.mrb[44].mxu1 %vm767_vm2, %v3010_v43 }
 0xe66   : > { %v3659_v12 = vpop.f32.mrb[40].mxu1 }
 0xe67   : > { %v3109_v9 = vadd.f32 %v3659_v12, %v3302_v1  ;;  %v3061_v11 = vpop.f32.mrb[41].mxu1 }
 0xe68   : > { %v3107_v40 = vadd.f32 %v3302_v1, %v3061_v11  ;;  %v3660_v21 = vpop.f32.mrb[42].mxu1 }
 0xe69   : > { %3117 = vst [vmem:[%s388_s11 + $0x10] sm:$0xff] %v3109_v9  ;;  %v3110_v59 = vadd.f32 %v3660_v21, %v3302_v1  ;;  %v3064_v44 = vpop.f32.mrb[43].mxu1 }
 0xe6a   : > { %3115 = vst [vmem:[%s388_s11] sm:$0xff] %v3107_v40  ;;  %v3108_v10 = vadd.f32 %v3302_v1, %v3064_v44 }
 0xe6b   : > { %3118 = vst [vmem:[%s388_s11 + $0x18] sm:$0xff] %v3110_v59 }
 0xe6c   : > { %3116 = vst [vmem:[%s388_s11 + $0x8] sm:$0xff] %v3108_v10 }
 0xea4   : > { %v3663_v16 = vpop.f32.mrb[44].mxu1 }
 0xea5   : > { %v3113_v33 = vadd.f32 %v3663_v16, %v3302_v1  ;;  %v3077_v36 = vpop.f32.mrb[45].mxu1 }
 0xea6   : > { %v3111_v61 = vadd.f32 %v3302_v1, %v3077_v36  ;;  %v3664_v39 = vpop.f32.mrb[46].mxu1 }
 0xea7   : > { %3121 = vst [vmem:[%s388_s11 + $0x30] sm:$0xff] %v3113_v33  ;;  %v3114_v62 = vadd.f32 %v3664_v39, %v3302_v1  ;;  %v3080_v0 = vpop.f32.mrb[47].mxu1 }
 0xea8   : > { %3119 = vst [vmem:[%s388_s11 + $0x20] sm:$0xff] %v3111_v61  ;;  %v3112_v25 = vadd.f32 %v3302_v1, %v3080_v0 }
 0xea9   : > { %3122 = vst [vmem:[%s388_s11 + $0x38] sm:$0xff] %v3114_v62 }
 0xeaa   : > { %3120 = vst [vmem:[%s388_s11 + $0x28] sm:$0xff] %v3112_v25 }
 0xeab   : > { %3964 = shalt.err (!%p3961_p7)
}
 0xeac   : > { %s3965_s27 = scalar_lea.hbm %s4893_s18, 1024  ;;  %s3969_s30 = scalar_lea.hbm %s4948_s10, 2048 }
 0xead   : > { %p3966_p8 = scmp.ne.s32.totalorder %s4893_s18, %s3965_s27  ;;  %p3970_p1 = scmp.lt.u32.totalorder %s4893_s18, %s4948_s10 }
 0xeae   : > { %p3971_p0 = scmp.lt.u32.totalorder %s3969_s30, %s3965_s27  ;;  %p3973_p6 = scmp.lt.u32.totalorder %s3965_s27, %s4893_s18 }
 0xeaf   : > { %p3967_p11 = pnand %p3966_p8, %p4959_p9 }
 0xeb0   : > { %p3972_p5 = por %p3971_p0, %p3970_p1 }
 0xeb1   : > { %p3968_p13 = pneg %p3967_p11 }
 0xeb2   : > { %p3974_p10 = por %p3973_p6, %p3972_p5 }
 0xeb4   : > { %p3975_p12 = pnand %p3974_p10, %p3968_p13 }
 0xeb6   : > { %3978 = shalt.err (!%p3975_p12)
}
 0xeb7   : > { %s4037_s20 = smov 128   ;;  %s4038_s21 = smov 8  }
 0xeb8   : > { %3697 = dma.vmem_to_hbm [thread:$0]  (%p4959_p9), %s4888_s29, 1024, %s4893_s18, %s4897_s17, %s4037_s20, %s4037_s20, %s4038_s21  }
 0xeb9 PF: > { %p3709_p2 = scmp.ge.s32.totalorder %s4017_s16, 2  ;;  %s3153_s26 = sand.u32 1, %s4005_s13  }
 0xeba   : > { %p4960_p3 = scmp.ne.s32.totalorder %s4953_s24, 0  ;;  %s3154_s27 = scalar_lea.sflag [#allocation4], %s3153_s26 }
 0xebc   : > { %p3704_p4 = pnand %p3709_p2, %p4960_p3 }
 0xebe   : > { %4000 = dma.done.wait (!%p3704_p4), %s3154_s27, 1024  }
 0xebf   : > { %4002 = vsyncadd (!%p3704_p4), %s3154_s27, 4294966272  ;;  %p21_p7 = scmp.ge.s32.totalorder %s4119_s19, 4   ;;  %s4961_s13 = smov %s4009_s14 }
 0xec0   : > { %s4962_s14 = smov %s4013_s15  ;;  %s4963_s15 = smov %s4130_s22 }
 0xec1   : > { %s4964_s16 = smov %s4119_s19  ;;  %23 = sbr.rel (!%p21_p7) target bundleno = 4 (0x4), region = 106 }
 0xec8   :  { %3159 = vsyncpa [#allocation3], 1 }
 0xec9   :  { %3161 = vsyncpa [#allocation3 + $0x1], 1 }
 0xeca   :  { %3162 = vsyncpa [#allocation4], 1 }
 0xecb   :  { %3164 = vsyncpa [#allocation4 + $0x1], 1 }

</bundles_post_ra>
